<compile_context>
chip_gen: v5e
topology: v5e:2x2
jax: 0.10.0
libtpu: 0.0.40
codegen_flags: <defaults>
</compile_context>

<pallas_src>
import functools

import jax
import jax.numpy as jnp
import numpy as np
from jax.experimental import pallas as pl
from jax.experimental.pallas import tpu as pltpu

_EPS = 1e-5


def _round_up(x, m):
    return (x + m - 1) // m * m


def _resblock_kernel(s, Ho, Wo, Cin, Cp, has_sc_conv, fuse_conv1,
                     xph_ref, w1_ref, w2_ref, *rest):
    """Fused residual block, one image per grid step.

    xph_ref : (1, s*s, Hps, Wps, Cin)  phase-decomposed zero-padded input (bf16)
    w1_ref  : (9*Cin, Cp)              conv1 weights, tap-major K layout (bf16)
    w2_ref  : (9*Cp, Cp)               conv2 weights as one fused matmul matrix (bf16)
    wsc_ref : (Cin, Cp)                1x1 shortcut conv weight (bf16, only if has_sc_conv)
    bns_ref : (3, 1, Cp)               folded BN scales  [bn1, bn2, bn_shortcut] (f32)
    bnb_ref : (3, 1, Cp)               folded BN biases  [bn1, bn2, bn_shortcut] (f32)
    o_ref   : (1, Ho*Wo, Cp)           output (f32)
    pad_ref : (Ho+2, Wo+2, Cp)         VMEM scratch: zero-padded conv1 activation
    """
    if has_sc_conv:
        wsc_ref, bns_ref, bnb_ref, o_ref, pad_ref = rest
    else:
        bns_ref, bnb_ref, o_ref, pad_ref = rest
    M = Ho * Wo

    def tap(kh, kw):
        # conv tap (kh, kw) reads x_pad[oh*s + kh, ow*s + kw]  ==
        # phase ((kh%s)*s + kw%s), contiguous offset (kh//s, kw//s).
        t = xph_ref[0, (kh % s) * s + (kw % s),
                    kh // s:kh // s + Ho, kw // s:kw // s + Wo, :]
        return t.reshape(M, Cin)

    # ---- conv1 (3x3, stride s): in-kernel im2col, f32 accumulation ----
    if fuse_conv1:
        # lane-aligned taps: one fused matmul, K = 9*Cin
        slab1 = jnp.concatenate(
            [tap(kh, kw) for kh in range(3) for kw in range(3)], axis=-1)
        acc = jnp.dot(slab1, w1_ref[...], preferred_element_type=jnp.float32)
    else:
        acc = jnp.zeros((M, Cp), jnp.float32)
        for t in range(9):
            kh, kw = t // 3, t % 3
            acc = acc + jnp.dot(tap(kh, kw),
                                w1_ref[t * Cin:(t + 1) * Cin, :],
                                preferred_element_type=jnp.float32)
    # BN1 (folded) + ReLU, in f32
    y1 = jnp.maximum(acc * bns_ref[0] + bnb_ref[0], 0.0)

    # ---- write y1 into the halo scratch; only the border needs zeroing ----
    zr = jnp.zeros((1, Wo + 2, Cp), jnp.float32)
    pad_ref[0:1, :, :] = zr
    pad_ref[Ho + 1:Ho + 2, :, :] = zr
    zc = jnp.zeros((Ho, 1, Cp), jnp.float32)
    pad_ref[1:Ho + 1, 0:1, :] = zc
    pad_ref[1:Ho + 1, Wo + 1:Wo + 2, :] = zc
    pad_ref[1:Ho + 1, 1:Wo + 1, :] = y1.reshape(Ho, Wo, Cp)

    # ---- conv2 (3x3, stride 1): single fused matmul with K = 9*Cp ----
    slab2 = jnp.concatenate(
        [pad_ref[kh:kh + Ho, kw:kw + Wo, :].reshape(M, Cp)
         for kh in range(3) for kw in range(3)], axis=-1)          # (M, 9*Cp)
    y2 = jnp.dot(slab2.astype(jnp.bfloat16), w2_ref[...],
                 preferred_element_type=jnp.float32)
    y2 = y2 * bns_ref[1] + bnb_ref[1]                              # BN2 (folded)

    # ---- shortcut: x sampled at stride s == tap offset (1, 1) of x_pad ----
    xs = tap(1, 1)
    if has_sc_conv:
        sc = jnp.dot(xs, wsc_ref[...], preferred_element_type=jnp.float32)
        sc = sc * bns_ref[2] + bnb_ref[2]                          # BN_sc (folded)
    else:
        # identity shortcut: no matmul, no BN (Cin == Cp in this branch).
        sc = xs.astype(jnp.float32)

    # ---- residual add + final ReLU (f32), lane-dense store ----
    o_ref[0, :, :] = jnp.maximum(y2 + sc, 0.0)


def residual_block_forward(x_nchw, params, stride):
    """ResidualBlock forward.  x_nchw: (N, Cin, H, W) float32, NCHW."""
    w1, w2 = params["w1"], params["w2"]
    Cout, Cin = w1.shape[0], w1.shape[1]
    N, _, H, W = x_nchw.shape
    Ho = (H - 1) // stride + 1
    Wo = (W - 1) // stride + 1
    M = Ho * Wo
    has_sc_conv = "wsc" in params

    Cp = _round_up(Cout, 128)                     # lane-dense output / matmul N
    # identity shortcut: pad input channels to Cp so the residual add is full width
    Cin_k = _round_up(Cin, 16) if has_sc_conv else Cp
    fuse_conv1 = (Cin_k % 128 == 0)               # lane-aligned tap concat is free

    # --- glue: NHWC, spatial zero-pad, space-to-depth phase rearrangement ---
    x = jnp.transpose(x_nchw, (0, 2, 3, 1))                       # NHWC
    Hp = _round_up(H + 2, stride)
    Wp = _round_up(W + 2, stride)
    x_pad = jnp.pad(x, ((0, 0), (1, Hp - H - 1), (1, Wp - W - 1),
                        (0, Cin_k - Cin)))
    Hps, Wps = Hp // stride, Wp // stride
    xph = x_pad.reshape(N, Hps, stride, Wps, stride, Cin_k)
    xph = jnp.transpose(xph, (0, 2, 4, 1, 3, 5))
    # xph[n, ph*s+pw, qh, qw, c] == x_pad[n, qh*s + ph, qw*s + pw, c]
    xph = xph.reshape(N, stride * stride, Hps, Wps, Cin_k).astype(jnp.bfloat16)

    # --- weights -> matmul layouts (OIHW -> (kh, kw, in, out)), padded, bf16 ---
    w1_k = jnp.transpose(w1, (2, 3, 1, 0))
    w1_k = jnp.pad(w1_k, ((0, 0), (0, 0), (0, Cin_k - Cin), (0, Cp - Cout)))
    w1_k = w1_k.reshape(9 * Cin_k, Cp).astype(jnp.bfloat16)

    w2_k = jnp.transpose(w2, (2, 3, 1, 0))
    w2_k = jnp.pad(w2_k, ((0, 0), (0, 0), (0, Cp - Cout), (0, Cp - Cout)))
    w2_k = w2_k.reshape(9 * Cp, Cp).astype(jnp.bfloat16)

    # --- eval-mode BatchNorm folded to per-channel scale & bias (f32) ---
    def fold(g, b, m, v):
        sc = g / jnp.sqrt(v + _EPS)
        return jnp.pad(sc, (0, Cp - Cout)), jnp.pad(b - m * sc, (0, Cp - Cout))

    s1, b1 = fold(params["bn1_g"], params["bn1_b"], params["bn1_m"], params["bn1_v"])
    s2, b2 = fold(params["bn2_g"], params["bn2_b"], params["bn2_m"], params["bn2_v"])

    inputs = [xph, w1_k, w2_k]
    in_specs = [
        pl.BlockSpec((1, stride * stride, Hps, Wps, Cin_k),
                     lambda b: (b, 0, 0, 0, 0)),                   # streamed
        pl.BlockSpec((9 * Cin_k, Cp), lambda b: (0, 0)),           # resident
        pl.BlockSpec((9 * Cp, Cp), lambda b: (0, 0)),              # resident
    ]
    if has_sc_conv:
        wsc_k = jnp.pad(params["wsc"][:, :, 0, 0].T,
                        ((0, Cin_k - Cin), (0, Cp - Cout))).astype(jnp.bfloat16)
        s3, b3 = fold(params["bnsc_g"], params["bnsc_b"],
                      params["bnsc_m"], params["bnsc_v"])
        inputs.append(wsc_k)
        in_specs.append(pl.BlockSpec((Cin_k, Cp), lambda b: (0, 0)))
    else:
        s3 = jnp.zeros((Cp,), jnp.float32)
        b3 = jnp.zeros((Cp,), jnp.float32)

    bns = jnp.stack([s1, s2, s3]).reshape(3, 1, Cp).astype(jnp.float32)
    bnb = jnp.stack([b1, b2, b3]).reshape(3, 1, Cp).astype(jnp.float32)
    inputs += [bns, bnb]
    in_specs += [pl.BlockSpec((3, 1, Cp), lambda b: (0, 0, 0))] * 2

    kernel = functools.partial(_resblock_kernel, stride, Ho, Wo, Cin_k, Cp,
                               has_sc_conv, fuse_conv1)
    out = pl.pallas_call(
        kernel,
        grid=(N,),
        out_shape=jax.ShapeDtypeStruct((N, M, Cp), jnp.float32),
        in_specs=in_specs,
        out_specs=pl.BlockSpec((1, M, Cp), lambda b: (b, 0, 0)),
        scratch_shapes=[pltpu.VMEM((Ho + 2, Wo + 2, Cp), jnp.float32)],
        compiler_params=pltpu.CompilerParams(
            dimension_semantics=("parallel",),        # megacore: split batch
            vmem_limit_bytes=32 * 1024 * 1024,
        ),
    )(*inputs)

    out = out.reshape(N, Ho, Wo, Cp)[..., :Cout]
    return jnp.transpose(out, (0, 3, 1, 2))                       # back to NCHW


# --------------------- reference (plain JAX / XLA, f32) ---------------------
def reference_forward(x_nchw, params, stride):
    def conv(x, w, s, p):
        return jax.lax.conv_general_dilated(
            x, w, window_strides=(s, s), padding=[(p, p), (p, p)],
            dimension_numbers=("NCHW", "OIHW", "NCHW"))

    def bn(x, g, b, m, v):
        g, b, m, v = (t[None, :, None, None] for t in (g, b, m, v))
        return (x - m) / jnp.sqrt(v + _EPS) * g + b

    y = conv(x_nchw, params["w1"], stride, 1)
    y = jax.nn.relu(bn(y, params["bn1_g"], params["bn1_b"],
                       params["bn1_m"], params["bn1_v"]))
    y = conv(y, params["w2"], 1, 1)
    y = bn(y, params["bn2_g"], params["bn2_b"], params["bn2_m"], params["bn2_v"])
    if "wsc" in params:
        sc = conv(x_nchw, params["wsc"], stride, 0)
        sc = bn(sc, params["bnsc_g"], params["bnsc_b"],
                params["bnsc_m"], params["bnsc_v"])
    else:
        sc = x_nchw
    return jax.nn.relu(y + sc)


def init_params(key, cin, cout, s):
    ks = jax.random.split(key, 12)
    params = {
        "w1": 0.1 * jax.random.normal(ks[0], (cout, cin, 3, 3), jnp.float32),
        "bn1_g": 0.5 + jax.random.uniform(ks[1], (cout,), jnp.float32),
        "bn1_b": 0.1 * jax.random.normal(ks[2], (cout,), jnp.float32),
        "bn1_m": 0.1 * jax.random.normal(ks[3], (cout,), jnp.float32),
        "bn1_v": 0.5 + jax.random.uniform(ks[4], (cout,), jnp.float32),
        "w2": 0.1 * jax.random.normal(ks[5], (cout, cout, 3, 3), jnp.float32),
        "bn2_g": 0.5 + jax.random.uniform(ks[6], (cout,), jnp.float32),
        "bn2_b": 0.1 * jax.random.normal(ks[7], (cout,), jnp.float32),
        "bn2_m": 0.1 * jax.random.normal(ks[8], (cout,), jnp.float32),
        "bn2_v": 0.5 + jax.random.uniform(ks[9], (cout,), jnp.float32),
    }
    if s != 1 or cin != cout:
        ks2 = jax.random.split(ks[10], 5)
        params.update({
            "wsc": 0.1 * jax.random.normal(ks2[0], (cout, cin, 1, 1), jnp.float32),
            "bnsc_g": 0.5 + jax.random.uniform(ks2[1], (cout,), jnp.float32),
            "bnsc_b": 0.1 * jax.random.normal(ks2[2], (cout,), jnp.float32),
            "bnsc_m": 0.1 * jax.random.normal(ks2[3], (cout,), jnp.float32),
            "bnsc_v": 0.5 + jax.random.uniform(ks2[4], (cout,), jnp.float32),
        })
    return params


def _run_case(key, N, Cin, Cout, H, W, stride):
    k_param, k_x = jax.random.split(key)
    params = init_params(k_param, Cin, Cout, stride)
    x = jax.random.normal(k_x, (N, Cin, H, W), jnp.float32)

    fwd = jax.jit(functools.partial(residual_block_forward, stride=stride))
    out = jax.block_until_ready(fwd(x, params))
    ref = reference_forward(x, params, stride)
    Ho = (H - 1) // stride + 1
    Wo = (W - 1) // stride + 1
    assert out.shape == ref.shape == (N, Cout, Ho, Wo)
    # bf16 MXU inputs with f32 accumulation -> looser tolerance than pure f32.
    np.testing.assert_allclose(np.asarray(out), np.asarray(ref),
                               atol=5e-2, rtol=5e-2)


if __name__ == "__main__":
    key = jax.random.PRNGKey(0)
    k1, k2 = jax.random.split(key)

    # Downsampling block: ResidualBlock(inchannel=4, outchannel=8, s=2)
    # -> 1x1 conv + BN shortcut, per-tap conv1 matmuls (Cin not lane-aligned).
    _run_case(k1, N=2, Cin=4, Cout=8, H=16, W=16, stride=2)

    # Identity block: ResidualBlock(inchannel=8, outchannel=8, s=1)
    # -> identity shortcut, fused single-matmul conv1 (lane-aligned K).
    _run_case(k2, N=2, Cin=8, Cout=8, H=16, W=16, stride=1)

    print("KERNEL_OK")
</pallas_src>

<mosaic_0001>
module attributes {stable_mosaic.version = 11 : i64} {
  func.func @_resblock_kernel(%arg0: i32, %arg1: memref<1x4x9x9x16xbf16, #tpu.memory_space<vmem>>, %arg2: memref<144x128xbf16, #tpu.memory_space<vmem>>, %arg3: memref<1152x128xbf16, #tpu.memory_space<vmem>>, %arg4: memref<16x128xbf16, #tpu.memory_space<vmem>>, %arg5: memref<3x1x128xf32, #tpu.memory_space<vmem>>, %arg6: memref<3x1x128xf32, #tpu.memory_space<vmem>>, %arg7: memref<1x64x128xf32, #tpu.memory_space<vmem>>, %arg8: memref<10x10x128xf32, #tpu.memory_space<vmem>>) attributes {dimension_semantics = [#tpu.dimension_semantics<parallel>], iteration_bounds = array<i64: 2>, scalar_prefetch = 0 : i64, scratch_operands = 1 : i64, tpu.core_type = #tpu.core_type<tc>, window_params = [{transform_indices = @transform_0, window_bounds = array<i64: 1, 4, 9, 9, 16>}, {pipeline_mode = #tpu.pipeline_mode<synchronous>, transform_indices = @transform_1, window_bounds = array<i64: 144, 128>}, {pipeline_mode = #tpu.pipeline_mode<synchronous>, transform_indices = @transform_2, window_bounds = array<i64: 1152, 128>}, {pipeline_mode = #tpu.pipeline_mode<synchronous>, transform_indices = @transform_3, window_bounds = array<i64: 16, 128>}, {pipeline_mode = #tpu.pipeline_mode<synchronous>, transform_indices = @transform_4, window_bounds = array<i64: 3, 1, 128>}, {pipeline_mode = #tpu.pipeline_mode<synchronous>, transform_indices = @transform_5, window_bounds = array<i64: 3, 1, 128>}, {transform_indices = @transform_6, window_bounds = array<i64: 1, 64, 128>}]} {
    %cst = arith.constant 0.000000e+00 : f32
    %0 = vector.broadcast %cst : f32 to vector<64x128xf32>
    %c0 = arith.constant 0 : index
    %c0_0 = arith.constant 0 : index
    %c0_1 = arith.constant 0 : index
    %c0_2 = arith.constant 0 : index
    %c0_3 = arith.constant 0 : index
    %1 = vector.load %arg1[%c0, %c0_0, %c0_1, %c0_2, %c0_3] : memref<1x4x9x9x16xbf16, #tpu.memory_space<vmem>>, vector<1x1x8x8x16xbf16>
    %2 = vector.shape_cast %1 : vector<1x1x8x8x16xbf16> to vector<8x8x16xbf16>
    %3 = vector.shape_cast %2 : vector<8x8x16xbf16> to vector<64x16xbf16>
    %c0_4 = arith.constant 0 : index
    %c0_5 = arith.constant 0 : index
    %4 = vector.load %arg2[%c0_4, %c0_5] : memref<144x128xbf16, #tpu.memory_space<vmem>>, vector<16x128xbf16>
    %cst_6 = arith.constant dense<0.000000e+00> : vector<64x128xf32>
    %5 = tpu.matmul %3, %4, %cst_6 {dimension_numbers = #tpu.dot_dimension_numbers<[1], [0], [0], [1], [0, 0, 1, 1], [], []>} : vector<64x16xbf16>, vector<16x128xbf16>, vector<64x128xf32> -> vector<64x128xf32>
    %6 = arith.addf %0, %5 : vector<64x128xf32>
    %c0_7 = arith.constant 0 : index
    %c1 = arith.constant 1 : index
    %c0_8 = arith.constant 0 : index
    %c0_9 = arith.constant 0 : index
    %c0_10 = arith.constant 0 : index
    %7 = vector.load %arg1[%c0_7, %c1, %c0_8, %c0_9, %c0_10] : memref<1x4x9x9x16xbf16, #tpu.memory_space<vmem>>, vector<1x1x8x8x16xbf16>
    %8 = vector.shape_cast %7 : vector<1x1x8x8x16xbf16> to vector<8x8x16xbf16>
    %9 = vector.shape_cast %8 : vector<8x8x16xbf16> to vector<64x16xbf16>
    %c16 = arith.constant 16 : index
    %c0_11 = arith.constant 0 : index
    %10 = vector.load %arg2[%c16, %c0_11] : memref<144x128xbf16, #tpu.memory_space<vmem>>, vector<16x128xbf16>
    %cst_12 = arith.constant dense<0.000000e+00> : vector<64x128xf32>
    %11 = tpu.matmul %9, %10, %cst_12 {dimension_numbers = #tpu.dot_dimension_numbers<[1], [0], [0], [1], [0, 0, 1, 1], [], []>} : vector<64x16xbf16>, vector<16x128xbf16>, vector<64x128xf32> -> vector<64x128xf32>
    %12 = arith.addf %6, %11 : vector<64x128xf32>
    %c0_13 = arith.constant 0 : index
    %c0_14 = arith.constant 0 : index
    %c0_15 = arith.constant 0 : index
    %c1_16 = arith.constant 1 : index
    %c0_17 = arith.constant 0 : index
    %13 = vector.load %arg1[%c0_13, %c0_14, %c0_15, %c1_16, %c0_17] : memref<1x4x9x9x16xbf16, #tpu.memory_space<vmem>>, vector<1x1x8x8x16xbf16>
    %14 = vector.shape_cast %13 : vector<1x1x8x8x16xbf16> to vector<8x8x16xbf16>
    %15 = vector.shape_cast %14 : vector<8x8x16xbf16> to vector<64x16xbf16>
    %c32 = arith.constant 32 : index
    %c0_18 = arith.constant 0 : index
    %16 = vector.load %arg2[%c32, %c0_18] : memref<144x128xbf16, #tpu.memory_space<vmem>>, vector<16x128xbf16>
    %cst_19 = arith.constant dense<0.000000e+00> : vector<64x128xf32>
    %17 = tpu.matmul %15, %16, %cst_19 {dimension_numbers = #tpu.dot_dimension_numbers<[1], [0], [0], [1], [0, 0, 1, 1], [], []>} : vector<64x16xbf16>, vector<16x128xbf16>, vector<64x128xf32> -> vector<64x128xf32>
    %18 = arith.addf %12, %17 : vector<64x128xf32>
    %c0_20 = arith.constant 0 : index
    %c2 = arith.constant 2 : index
    %c0_21 = arith.constant 0 : index
    %c0_22 = arith.constant 0 : index
    %c0_23 = arith.constant 0 : index
    %19 = vector.load %arg1[%c0_20, %c2, %c0_21, %c0_22, %c0_23] : memref<1x4x9x9x16xbf16, #tpu.memory_space<vmem>>, vector<1x1x8x8x16xbf16>
    %20 = vector.shape_cast %19 : vector<1x1x8x8x16xbf16> to vector<8x8x16xbf16>
    %21 = vector.shape_cast %20 : vector<8x8x16xbf16> to vector<64x16xbf16>
    %c48 = arith.constant 48 : index
    %c0_24 = arith.constant 0 : index
    %22 = vector.load %arg2[%c48, %c0_24] : memref<144x128xbf16, #tpu.memory_space<vmem>>, vector<16x128xbf16>
    %cst_25 = arith.constant dense<0.000000e+00> : vector<64x128xf32>
    %23 = tpu.matmul %21, %22, %cst_25 {dimension_numbers = #tpu.dot_dimension_numbers<[1], [0], [0], [1], [0, 0, 1, 1], [], []>} : vector<64x16xbf16>, vector<16x128xbf16>, vector<64x128xf32> -> vector<64x128xf32>
    %24 = arith.addf %18, %23 : vector<64x128xf32>
    %c0_26 = arith.constant 0 : index
    %c3 = arith.constant 3 : index
    %c0_27 = arith.constant 0 : index
    %c0_28 = arith.constant 0 : index
    %c0_29 = arith.constant 0 : index
    %25 = vector.load %arg1[%c0_26, %c3, %c0_27, %c0_28, %c0_29] : memref<1x4x9x9x16xbf16, #tpu.memory_space<vmem>>, vector<1x1x8x8x16xbf16>
    %26 = vector.shape_cast %25 : vector<1x1x8x8x16xbf16> to vector<8x8x16xbf16>
    %27 = vector.shape_cast %26 : vector<8x8x16xbf16> to vector<64x16xbf16>
    %c64 = arith.constant 64 : index
    %c0_30 = arith.constant 0 : index
    %28 = vector.load %arg2[%c64, %c0_30] : memref<144x128xbf16, #tpu.memory_space<vmem>>, vector<16x128xbf16>
    %cst_31 = arith.constant dense<0.000000e+00> : vector<64x128xf32>
    %29 = tpu.matmul %27, %28, %cst_31 {dimension_numbers = #tpu.dot_dimension_numbers<[1], [0], [0], [1], [0, 0, 1, 1], [], []>} : vector<64x16xbf16>, vector<16x128xbf16>, vector<64x128xf32> -> vector<64x128xf32>
    %30 = arith.addf %24, %29 : vector<64x128xf32>
    %c0_32 = arith.constant 0 : index
    %c2_33 = arith.constant 2 : index
    %c0_34 = arith.constant 0 : index
    %c1_35 = arith.constant 1 : index
    %c0_36 = arith.constant 0 : index
    %31 = vector.load %arg1[%c0_32, %c2_33, %c0_34, %c1_35, %c0_36] : memref<1x4x9x9x16xbf16, #tpu.memory_space<vmem>>, vector<1x1x8x8x16xbf16>
    %32 = vector.shape_cast %31 : vector<1x1x8x8x16xbf16> to vector<8x8x16xbf16>
    %33 = vector.shape_cast %32 : vector<8x8x16xbf16> to vector<64x16xbf16>
    %c80 = arith.constant 80 : index
    %c0_37 = arith.constant 0 : index
    %34 = vector.load %arg2[%c80, %c0_37] : memref<144x128xbf16, #tpu.memory_space<vmem>>, vector<16x128xbf16>
    %cst_38 = arith.constant dense<0.000000e+00> : vector<64x128xf32>
    %35 = tpu.matmul %33, %34, %cst_38 {dimension_numbers = #tpu.dot_dimension_numbers<[1], [0], [0], [1], [0, 0, 1, 1], [], []>} : vector<64x16xbf16>, vector<16x128xbf16>, vector<64x128xf32> -> vector<64x128xf32>
    %36 = arith.addf %30, %35 : vector<64x128xf32>
    %c0_39 = arith.constant 0 : index
    %c0_40 = arith.constant 0 : index
    %c1_41 = arith.constant 1 : index
    %c0_42 = arith.constant 0 : index
    %c0_43 = arith.constant 0 : index
    %37 = vector.load %arg1[%c0_39, %c0_40, %c1_41, %c0_42, %c0_43] : memref<1x4x9x9x16xbf16, #tpu.memory_space<vmem>>, vector<1x1x8x8x16xbf16>
    %38 = vector.shape_cast %37 : vector<1x1x8x8x16xbf16> to vector<8x8x16xbf16>
    %39 = vector.shape_cast %38 : vector<8x8x16xbf16> to vector<64x16xbf16>
    %c96 = arith.constant 96 : index
    %c0_44 = arith.constant 0 : index
    %40 = vector.load %arg2[%c96, %c0_44] : memref<144x128xbf16, #tpu.memory_space<vmem>>, vector<16x128xbf16>
    %cst_45 = arith.constant dense<0.000000e+00> : vector<64x128xf32>
    %41 = tpu.matmul %39, %40, %cst_45 {dimension_numbers = #tpu.dot_dimension_numbers<[1], [0], [0], [1], [0, 0, 1, 1], [], []>} : vector<64x16xbf16>, vector<16x128xbf16>, vector<64x128xf32> -> vector<64x128xf32>
    %42 = arith.addf %36, %41 : vector<64x128xf32>
    %c0_46 = arith.constant 0 : index
    %c1_47 = arith.constant 1 : index
    %c1_48 = arith.constant 1 : index
    %c0_49 = arith.constant 0 : index
    %c0_50 = arith.constant 0 : index
    %43 = vector.load %arg1[%c0_46, %c1_47, %c1_48, %c0_49, %c0_50] : memref<1x4x9x9x16xbf16, #tpu.memory_space<vmem>>, vector<1x1x8x8x16xbf16>
    %44 = vector.shape_cast %43 : vector<1x1x8x8x16xbf16> to vector<8x8x16xbf16>
    %45 = vector.shape_cast %44 : vector<8x8x16xbf16> to vector<64x16xbf16>
    %c112 = arith.constant 112 : index
    %c0_51 = arith.constant 0 : index
    %46 = vector.load %arg2[%c112, %c0_51] : memref<144x128xbf16, #tpu.memory_space<vmem>>, vector<16x128xbf16>
    %cst_52 = arith.constant dense<0.000000e+00> : vector<64x128xf32>
    %47 = tpu.matmul %45, %46, %cst_52 {dimension_numbers = #tpu.dot_dimension_numbers<[1], [0], [0], [1], [0, 0, 1, 1], [], []>} : vector<64x16xbf16>, vector<16x128xbf16>, vector<64x128xf32> -> vector<64x128xf32>
    %48 = arith.addf %42, %47 : vector<64x128xf32>
    %c0_53 = arith.constant 0 : index
    %c0_54 = arith.constant 0 : index
    %c1_55 = arith.constant 1 : index
    %c1_56 = arith.constant 1 : index
    %c0_57 = arith.constant 0 : index
    %49 = vector.load %arg1[%c0_53, %c0_54, %c1_55, %c1_56, %c0_57] : memref<1x4x9x9x16xbf16, #tpu.memory_space<vmem>>, vector<1x1x8x8x16xbf16>
    %50 = vector.shape_cast %49 : vector<1x1x8x8x16xbf16> to vector<8x8x16xbf16>
    %51 = vector.shape_cast %50 : vector<8x8x16xbf16> to vector<64x16xbf16>
    %c128 = arith.constant 128 : index
    %c0_58 = arith.constant 0 : index
    %52 = vector.load %arg2[%c128, %c0_58] : memref<144x128xbf16, #tpu.memory_space<vmem>>, vector<16x128xbf16>
    %cst_59 = arith.constant dense<0.000000e+00> : vector<64x128xf32>
    %53 = tpu.matmul %51, %52, %cst_59 {dimension_numbers = #tpu.dot_dimension_numbers<[1], [0], [0], [1], [0, 0, 1, 1], [], []>} : vector<64x16xbf16>, vector<16x128xbf16>, vector<64x128xf32> -> vector<64x128xf32>
    %54 = arith.addf %48, %53 : vector<64x128xf32>
    %c0_60 = arith.constant 0 : index
    %c0_61 = arith.constant 0 : index
    %c0_62 = arith.constant 0 : index
    %55 = vector.load %arg5[%c0_60, %c0_61, %c0_62] : memref<3x1x128xf32, #tpu.memory_space<vmem>>, vector<1x1x128xf32>
    %56 = vector.shape_cast %55 : vector<1x1x128xf32> to vector<1x128xf32>
    %57 = vector.broadcast %56 : vector<1x128xf32> to vector<64x128xf32>
    %58 = arith.mulf %54, %57 : vector<64x128xf32>
    %c0_63 = arith.constant 0 : index
    %c0_64 = arith.constant 0 : index
    %c0_65 = arith.constant 0 : index
    %59 = vector.load %arg6[%c0_63, %c0_64, %c0_65] : memref<3x1x128xf32, #tpu.memory_space<vmem>>, vector<1x1x128xf32>
    %60 = vector.shape_cast %59 : vector<1x1x128xf32> to vector<1x128xf32>
    %61 = vector.broadcast %60 : vector<1x128xf32> to vector<64x128xf32>
    %62 = arith.addf %58, %61 : vector<64x128xf32>
    %cst_66 = arith.constant 0.000000e+00 : f32
    %63 = vector.broadcast %cst_66 : f32 to vector<64x128xf32>
    %64 = arith.maximumf %62, %63 : vector<64x128xf32>
    %cst_67 = arith.constant 0.000000e+00 : f32
    %65 = vector.broadcast %cst_67 : f32 to vector<1x10x128xf32>
    %c0_68 = arith.constant 0 : index
    %c0_69 = arith.constant 0 : index
    %c0_70 = arith.constant 0 : index
    %66 = vector.load %arg8[%c0_68, %c0_69, %c0_70] : memref<10x10x128xf32, #tpu.memory_space<vmem>>, vector<1x10x128xf32>
    tpu.vector_store %arg8[%c0_68, %c0_69, %c0_70], %65 {strides = array<i32>} : memref<10x10x128xf32, #tpu.memory_space<vmem>>, vector<1x10x128xf32>,
    %c9 = arith.constant 9 : index
    %c0_71 = arith.constant 0 : index
    %c0_72 = arith.constant 0 : index
    %67 = vector.load %arg8[%c9, %c0_71, %c0_72] : memref<10x10x128xf32, #tpu.memory_space<vmem>>, vector<1x10x128xf32>
    tpu.vector_store %arg8[%c9, %c0_71, %c0_72], %65 {strides = array<i32>} : memref<10x10x128xf32, #tpu.memory_space<vmem>>, vector<1x10x128xf32>,
    %cst_73 = arith.constant 0.000000e+00 : f32
    %68 = vector.broadcast %cst_73 : f32 to vector<8x1x128xf32>
    %c1_74 = arith.constant 1 : index
    %c0_75 = arith.constant 0 : index
    %c0_76 = arith.constant 0 : index
    %69 = vector.load %arg8[%c1_74, %c0_75, %c0_76] : memref<10x10x128xf32, #tpu.memory_space<vmem>>, vector<8x1x128xf32>
    tpu.vector_store %arg8[%c1_74, %c0_75, %c0_76], %68 {strides = array<i32>} : memref<10x10x128xf32, #tpu.memory_space<vmem>>, vector<8x1x128xf32>,
    %c1_77 = arith.constant 1 : index
    %c9_78 = arith.constant 9 : index
    %c0_79 = arith.constant 0 : index
    %70 = vector.load %arg8[%c1_77, %c9_78, %c0_79] : memref<10x10x128xf32, #tpu.memory_space<vmem>>, vector<8x1x128xf32>
    tpu.vector_store %arg8[%c1_77, %c9_78, %c0_79], %68 {strides = array<i32>} : memref<10x10x128xf32, #tpu.memory_space<vmem>>, vector<8x1x128xf32>,
    %71 = vector.shape_cast %64 : vector<64x128xf32> to vector<8x8x128xf32>
    %c1_80 = arith.constant 1 : index
    %c1_81 = arith.constant 1 : index
    %c0_82 = arith.constant 0 : index
    %72 = vector.load %arg8[%c1_80, %c1_81, %c0_82] : memref<10x10x128xf32, #tpu.memory_space<vmem>>, vector<8x8x128xf32>
    tpu.vector_store %arg8[%c1_80, %c1_81, %c0_82], %71 {strides = array<i32>} : memref<10x10x128xf32, #tpu.memory_space<vmem>>, vector<8x8x128xf32>,
    %c0_83 = arith.constant 0 : index
    %c0_84 = arith.constant 0 : index
    %c0_85 = arith.constant 0 : index
    %73 = vector.load %arg8[%c0_83, %c0_84, %c0_85] : memref<10x10x128xf32, #tpu.memory_space<vmem>>, vector<8x8x128xf32>
    %74 = vector.shape_cast %73 : vector<8x8x128xf32> to vector<64x128xf32>
    %c0_86 = arith.constant 0 : index
    %c1_87 = arith.constant 1 : index
    %c0_88 = arith.constant 0 : index
    %75 = vector.load %arg8[%c0_86, %c1_87, %c0_88] : memref<10x10x128xf32, #tpu.memory_space<vmem>>, vector<8x8x128xf32>
    %76 = vector.shape_cast %75 : vector<8x8x128xf32> to vector<64x128xf32>
    %c0_89 = arith.constant 0 : index
    %c2_90 = arith.constant 2 : index
    %c0_91 = arith.constant 0 : index
    %77 = vector.load %arg8[%c0_89, %c2_90, %c0_91] : memref<10x10x128xf32, #tpu.memory_space<vmem>>, vector<8x8x128xf32>
    %78 = vector.shape_cast %77 : vector<8x8x128xf32> to vector<64x128xf32>
    %c1_92 = arith.constant 1 : index
    %c0_93 = arith.constant 0 : index
    %c0_94 = arith.constant 0 : index
    %79 = vector.load %arg8[%c1_92, %c0_93, %c0_94] : memref<10x10x128xf32, #tpu.memory_space<vmem>>, vector<8x8x128xf32>
    %80 = vector.shape_cast %79 : vector<8x8x128xf32> to vector<64x128xf32>
    %c1_95 = arith.constant 1 : index
    %c1_96 = arith.constant 1 : index
    %c0_97 = arith.constant 0 : index
    %81 = vector.load %arg8[%c1_95, %c1_96, %c0_97] : memref<10x10x128xf32, #tpu.memory_space<vmem>>, vector<8x8x128xf32>
    %82 = vector.shape_cast %81 : vector<8x8x128xf32> to vector<64x128xf32>
    %c1_98 = arith.constant 1 : index
    %c2_99 = arith.constant 2 : index
    %c0_100 = arith.constant 0 : index
    %83 = vector.load %arg8[%c1_98, %c2_99, %c0_100] : memref<10x10x128xf32, #tpu.memory_space<vmem>>, vector<8x8x128xf32>
    %84 = vector.shape_cast %83 : vector<8x8x128xf32> to vector<64x128xf32>
    %c2_101 = arith.constant 2 : index
    %c0_102 = arith.constant 0 : index
    %c0_103 = arith.constant 0 : index
    %85 = vector.load %arg8[%c2_101, %c0_102, %c0_103] : memref<10x10x128xf32, #tpu.memory_space<vmem>>, vector<8x8x128xf32>
    %86 = vector.shape_cast %85 : vector<8x8x128xf32> to vector<64x128xf32>
    %c2_104 = arith.constant 2 : index
    %c1_105 = arith.constant 1 : index
    %c0_106 = arith.constant 0 : index
    %87 = vector.load %arg8[%c2_104, %c1_105, %c0_106] : memref<10x10x128xf32, #tpu.memory_space<vmem>>, vector<8x8x128xf32>
    %88 = vector.shape_cast %87 : vector<8x8x128xf32> to vector<64x128xf32>
    %c2_107 = arith.constant 2 : index
    %c2_108 = arith.constant 2 : index
    %c0_109 = arith.constant 0 : index
    %89 = vector.load %arg8[%c2_107, %c2_108, %c0_109] : memref<10x10x128xf32, #tpu.memory_space<vmem>>, vector<8x8x128xf32>
    %90 = vector.shape_cast %89 : vector<8x8x128xf32> to vector<64x128xf32>
    %91 = tpu.concatenate %74, %76, %78, %80, %82, %84, %86, %88, %90 in 1 : vector<64x128xf32>, vector<64x128xf32>, vector<64x128xf32>, vector<64x128xf32>, vector<64x128xf32>, vector<64x128xf32>, vector<64x128xf32>, vector<64x128xf32>, vector<64x128xf32> -> vector<64x1152xf32>
    %92 = arith.truncf %91 : vector<64x1152xf32> to vector<64x1152xbf16>
    %c0_110 = arith.constant 0 : index
    %c0_111 = arith.constant 0 : index
    %93 = vector.load %arg3[%c0_110, %c0_111] : memref<1152x128xbf16, #tpu.memory_space<vmem>>, vector<1152x128xbf16>
    %cst_112 = arith.constant dense<0.000000e+00> : vector<64x128xf32>
    %94 = tpu.matmul %92, %93, %cst_112 {dimension_numbers = #tpu.dot_dimension_numbers<[1], [0], [0], [1], [0, 0, 1, 1], [], []>} : vector<64x1152xbf16>, vector<1152x128xbf16>, vector<64x128xf32> -> vector<64x128xf32>
    %c1_113 = arith.constant 1 : index
    %c0_114 = arith.constant 0 : index
    %c0_115 = arith.constant 0 : index
    %95 = vector.load %arg5[%c1_113, %c0_114, %c0_115] : memref<3x1x128xf32, #tpu.memory_space<vmem>>, vector<1x1x128xf32>
    %96 = vector.shape_cast %95 : vector<1x1x128xf32> to vector<1x128xf32>
    %97 = vector.broadcast %96 : vector<1x128xf32> to vector<64x128xf32>
    %98 = arith.mulf %94, %97 : vector<64x128xf32>
    %c1_116 = arith.constant 1 : index
    %c0_117 = arith.constant 0 : index
    %c0_118 = arith.constant 0 : index
    %99 = vector.load %arg6[%c1_116, %c0_117, %c0_118] : memref<3x1x128xf32, #tpu.memory_space<vmem>>, vector<1x1x128xf32>
    %100 = vector.shape_cast %99 : vector<1x1x128xf32> to vector<1x128xf32>
    %101 = vector.broadcast %100 : vector<1x128xf32> to vector<64x128xf32>
    %102 = arith.addf %98, %101 : vector<64x128xf32>
    %c0_119 = arith.constant 0 : index
    %c3_120 = arith.constant 3 : index
    %c0_121 = arith.constant 0 : index
    %c0_122 = arith.constant 0 : index
    %c0_123 = arith.constant 0 : index
    %103 = vector.load %arg1[%c0_119, %c3_120, %c0_121, %c0_122, %c0_123] : memref<1x4x9x9x16xbf16, #tpu.memory_space<vmem>>, vector<1x1x8x8x16xbf16>
    %104 = vector.shape_cast %103 : vector<1x1x8x8x16xbf16> to vector<8x8x16xbf16>
    %105 = vector.shape_cast %104 : vector<8x8x16xbf16> to vector<64x16xbf16>
    %c0_124 = arith.constant 0 : index
    %c0_125 = arith.constant 0 : index
    %106 = vector.load %arg4[%c0_124, %c0_125] : memref<16x128xbf16, #tpu.memory_space<vmem>>, vector<16x128xbf16>
    %cst_126 = arith.constant dense<0.000000e+00> : vector<64x128xf32>
    %107 = tpu.matmul %105, %106, %cst_126 {dimension_numbers = #tpu.dot_dimension_numbers<[1], [0], [0], [1], [0, 0, 1, 1], [], []>} : vector<64x16xbf16>, vector<16x128xbf16>, vector<64x128xf32> -> vector<64x128xf32>
    %c2_127 = arith.constant 2 : index
    %c0_128 = arith.constant 0 : index
    %c0_129 = arith.constant 0 : index
    %108 = vector.load %arg5[%c2_127, %c0_128, %c0_129] : memref<3x1x128xf32, #tpu.memory_space<vmem>>, vector<1x1x128xf32>
    %109 = vector.shape_cast %108 : vector<1x1x128xf32> to vector<1x128xf32>
    %110 = vector.broadcast %109 : vector<1x128xf32> to vector<64x128xf32>
    %111 = arith.mulf %107, %110 : vector<64x128xf32>
    %c2_130 = arith.constant 2 : index
    %c0_131 = arith.constant 0 : index
    %c0_132 = arith.constant 0 : index
    %112 = vector.load %arg6[%c2_130, %c0_131, %c0_132] : memref<3x1x128xf32, #tpu.memory_space<vmem>>, vector<1x1x128xf32>
    %113 = vector.shape_cast %112 : vector<1x1x128xf32> to vector<1x128xf32>
    %114 = vector.broadcast %113 : vector<1x128xf32> to vector<64x128xf32>
    %115 = arith.addf %111, %114 : vector<64x128xf32>
    %116 = arith.addf %102, %115 : vector<64x128xf32>
    %cst_133 = arith.constant 0.000000e+00 : f32
    %117 = vector.broadcast %cst_133 : f32 to vector<64x128xf32>
    %118 = arith.maximumf %116, %117 : vector<64x128xf32>
    %c0_134 = arith.constant 0 : index
    %c0_135 = arith.constant 0 : index
    %c0_136 = arith.constant 0 : index
    %119 = vector.load %arg7[%c0_134, %c0_135, %c0_136] : memref<1x64x128xf32, #tpu.memory_space<vmem>>, vector<1x64x128xf32>
    %120 = vector.shape_cast %119 : vector<1x64x128xf32> to vector<64x128xf32>
    %121 = vector.shape_cast %118 : vector<64x128xf32> to vector<1x64x128xf32>
    tpu.vector_store %arg7[%c0_134, %c0_135, %c0_136], %121 {strides = array<i32>} : memref<1x64x128xf32, #tpu.memory_space<vmem>>, vector<1x64x128xf32>,
    return
  }
  func.func @transform_0(%arg0: i32) -> (i32, i32, i32, i32, i32) {
    %c0_i32 = arith.constant 0 : i32
    %c0_i32_0 = arith.constant 0 : i32
    %c0_i32_1 = arith.constant 0 : i32
    %c0_i32_2 = arith.constant 0 : i32
    %c0_i32_3 = arith.constant 0 : i32
    return %arg0, %c0_i32, %c0_i32_0, %c0_i32_1, %c0_i32_2 : i32, i32, i32, i32, i32
  }
  func.func @transform_1(%arg0: i32) -> (i32, i32) {
    %c0_i32 = arith.constant 0 : i32
    %c0_i32_0 = arith.constant 0 : i32
    %c0_i32_1 = arith.constant 0 : i32
    return %c0_i32, %c0_i32_0 : i32, i32
  }
  func.func @transform_2(%arg0: i32) -> (i32, i32) {
    %c0_i32 = arith.constant 0 : i32
    %c0_i32_0 = arith.constant 0 : i32
    %c0_i32_1 = arith.constant 0 : i32
    return %c0_i32, %c0_i32_0 : i32, i32
  }
  func.func @transform_3(%arg0: i32) -> (i32, i32) {
    %c0_i32 = arith.constant 0 : i32
    %c0_i32_0 = arith.constant 0 : i32
    %c0_i32_1 = arith.constant 0 : i32
    return %c0_i32, %c0_i32_0 : i32, i32
  }
  func.func @transform_4(%arg0: i32) -> (i32, i32, i32) {
    %c0_i32 = arith.constant 0 : i32
    %c0_i32_0 = arith.constant 0 : i32
    %c0_i32_1 = arith.constant 0 : i32
    %c0_i32_2 = arith.constant 0 : i32
    return %c0_i32, %c0_i32_0, %c0_i32_1 : i32, i32, i32
  }
  func.func @transform_5(%arg0: i32) -> (i32, i32, i32) {
    %c0_i32 = arith.constant 0 : i32
    %c0_i32_0 = arith.constant 0 : i32
    %c0_i32_1 = arith.constant 0 : i32
    %c0_i32_2 = arith.constant 0 : i32
    return %c0_i32, %c0_i32_0, %c0_i32_1 : i32, i32, i32
  }
  func.func @transform_6(%arg0: i32) -> (i32, i32, i32) {
    %c0_i32 = arith.constant 0 : i32
    %c0_i32_0 = arith.constant 0 : i32
    %c0_i32_1 = arith.constant 0 : i32
    return %arg0, %c0_i32, %c0_i32_0 : i32, i32, i32
  }
}

</mosaic_0001>

<bundles_post_ra>
// kernel: residual_block_forward.1
= control target key start
LH: loop header
LB: loop body
LE: loop exit
PB: predicated region body
PF: predicated region fallthrough
CT: control target
= control target key end

     0   :  { %s3311_s21 = smov 0   ;;  %s4180_s0 = inlined_call_operand.vmem [shape: bf16[2,4,9,9,16], index: 0, kind: input, shape index: {}]   ;;  %s4181_s1 = inlined_call_operand.vmem [shape: bf16[144,128], index: 1, kind: input, shape index: {}]   ;;  %s4182_s2 = inlined_call_operand.vmem [shape: bf16[1152,128], index: 2, kind: input, shape index: {}]   ;;  %s4183_s3 = inlined_call_operand.vmem [shape: bf16[16,128], index: 3, kind: input, shape index: {}]   ;;  %s4184_s4 = inlined_call_operand.vmem [shape: f32[3,1,128], index: 4, kind: input, shape index: {}]   ;;  %s4185_s5 = inlined_call_operand.vmem [shape: f32[3,1,128], index: 5, kind: input, shape index: {}]   ;;  %s4186_s6 = inlined_call_operand.vmem [shape: f32[2,64,128], index: 6, kind: output, shape index: {}]  }
   0x1 LB: > { %s2563_s22 = sadd.s32 4294967295, %s3273_s21   ;;  %p2567_p0 = scmp.ge.s32.totalorder %s3273_s21, 1  ;;  %s3273_s21 = sphi %s3311_s21, %s16_s21  }
   0x2   : > { %p212_p1 = scmp.lt.s32.totalorder %s3273_s21, 3 }
   0x4   : > { %p213_p2 = pnand %p2567_p0, %p212_p1 }
   0x5   : > { %p242_p3 = scmp.lt.s32.totalorder (!%p213_p2), %s2563_s22, 1 }
   0x6   : > { %216 = sbr.rel (%p213_p2) target bundleno = 627 (0x273), region = 44 }
   0xb   : > { %v3147_v0 = vld [vmem:[%s4181_s1 + $0x8] sm:$0xff]  ;;  %v3142_v1 = vld [vmem:[%s4181_s1] sm:$0xff]  ;;  %v3148_v2 = vld [vmem:[%s4181_s1 + $0x10] sm:$0xff]  ;;  %s4190_s22 = smov (!%p242_p3, %s2563_s22), 1  ;;  %vm300_vm0 = vcmask 130048  }
   0xc   : > { %v3153_v3 = vld [vmem:[%s4181_s1 + $0x18] sm:$0xff]  ;;  %320 = vmatpush.bf16.msra.mxu0 %v3147_v0  ;;  %579 = vmatpush.bf16.msra.mxu2 %v3148_v2  ;;  %s3251_s7 = smul.u32 288, %s4190_s22  ;;  %vm425_vm1 = vsmask.f32 3328  ;;  %vm426_vm2 = vsmask.f32 7440 }
   0xd   : > { %3249 = vmatpush.bf16.msra.mxu3 %v3148_v2  ;;  %3248 = vmatpush.bf16.msra.mxu1 %v3142_v1  ;;  %vm3352_vm3 = vmor %vm425_vm1, %vm426_vm2  ;;  %s3137_s9 = sshll.u32 %s4190_s22, 6 }
   0xe   : > { %s3337_s10 = scalar_lea.vmem %s4180_s0, %s3251_s7  ;;  %s4117_s13 = scalar_lea.vmem %s4186_s6, %s3137_s9 }
   0xf   : > { %v2581_v4 = vld [vmem:[%s3337_s10 + $0x48] sm:$0xf]  ;;  %v3143_v5 = vld [vmem:[%s3337_s10 + $0x4c] sm:$0xf0]  ;;  %v409_v6 = vld [vmem:[%s3337_s10] sm:$0xf] }
  0x10   : > { %387 = vmatpush.bf16.msrb.mxu0 %v3142_v1  ;;  %v2582_v7 = vor.u32 %v3143_v5, %v2581_v4  ;;  %v410_v8 = vld [vmem:[%s3337_s10 + $0x4] sm:$0x1]  ;;  %v411_v9 = vld [vmem:[%s3337_s10 + $0x8] sm:$0xf]  ;;  %v412_v10 = vld [vmem:[%s3337_s10 + $0xc] sm:$0x1] }
  0x11   : > { %665 = vmatpush.bf16.msrb.mxu3 %v3153_v3  ;;  %v429_v11 = vshrl.u32 %v409_v6, 16  ;;  %v432_v12 = vshll.u32 %v409_v6, 16  ;;  %v438_v13 = vshll.u32 %v410_v8, 16  ;;  %v443_v14 = vshrl.u32 %v411_v9, 16  ;;  %v421_v15 = vld [vmem:[%s3337_s10 + $0x30] sm:$0xf] }
  0x12   : > { %2599 = vmatmul.msk.bf16.vlgmr.msra.gmra.mxu0 %vm300_vm0, %v2582_v7  ;;  %v446_v16 = vshll.u32 %v411_v9, 16  ;;  %v452_v17 = vshll.u32 %v412_v10, 16  ;;  %v422_v18 = vld [vmem:[%s3337_s10 + $0x34] sm:$0x1]  ;;  %v423_v19 = vld [vmem:[%s3337_s10 + $0x38] sm:$0xf] }
  0x13   : > { %v431_v20 = vrot.slane %v429_v11, 4  ;;  %v434_v21 = vrot.slane %v432_v12, 5  ;;  %v440_v22 = vrot.slane %v438_v13, 5  ;;  %v445_v23 = vrot.slane %v443_v14, 4  ;;  %v424_v24 = vld [vmem:[%s3337_s10 + $0x3c] sm:$0x1] }
  0x14   : > { %v448_v25 = vrot.slane %v446_v16, 5  ;;  %v454_v26 = vrot.slane %v452_v17, 5  ;;  %v513_v27 = vshrl.u32 %v421_v15, 16  ;;  %v516_v28 = vshll.u32 %v421_v15, 16  ;;  %v2609_v38 = vld [vmem:[%s3337_s10 + $0x10] sm:$0xf] }
  0x15   : > { %v435_v29 = vor.u32 %v434_v21, %v431_v20  ;;  %v522_v30 = vshll.u32 %v422_v18, 16  ;;  %v527_v31 = vshrl.u32 %v423_v19, 16  ;;  %v530_v32 = vshll.u32 %v423_v19, 16  ;;  %v3139_v43 = vld [vmem:[%s3337_s10 + $0x14] sm:$0xf0] }
  0x16   : > { %v449_v34 = vor.u32 %v448_v25, %v445_v23  ;;  %v515_v35 = vrot.slane %v513_v27, 4  ;;  %v518_v36 = vrot.slane %v516_v28, 5  ;;  %v536_v37 = vshll.u32 %v424_v24, 16  ;;  %v413_v47 = vld [vmem:[%s3337_s10 + $0x10] sm:$0xf]  ;;  %v3169_v14 = vld [vmem:[%s4181_s1 + $0x38] sm:$0xff] }
  0x17   : > { %v436_v39 = vrot.slane %v435_v29, 4  ;;  %v524_v40 = vrot.slane %v522_v30, 5  ;;  %v529_v41 = vrot.slane %v527_v31, 4  ;;  %v532_v42 = vrot.slane %v530_v32, 5  ;;  %v414_v48 = vld [vmem:[%s3337_s10 + $0x14] sm:$0x1] }
  0x18   : > { %v450_v44 = vrot.slane %v449_v34, 4  ;;  %v519_v45 = vor.u32 %v518_v36, %v515_v35  ;;  %v538_v46 = vrot.slane %v536_v37, 5  ;;  %v2610_v51 = vor.u32 %v3139_v43, %v2609_v38  ;;  %v415_v52 = vld [vmem:[%s3337_s10 + $0x18] sm:$0xf]  ;;  %v3144_v58 = vld [vmem:[%s3337_s10 + $0x5c] sm:$0xf0] }
  0x19   : > { %v441_v49 = vsel %vm3352_vm3, %v436_v39, %v440_v22  ;;  %v533_v50 = vor.u32 %v532_v42, %v529_v41  ;;  %v457_v53 = vshrl.u32 %v413_v47, 16  ;;  %v2585_v57 = vld [vmem:[%s3337_s10 + $0x58] sm:$0xf]  ;;  %v460_v59 = vshll.u32 %v413_v47, 16  ;;  %v416_v1 = vld [vmem:[%s3337_s10 + $0x1c] sm:$0x1] }
  0x1a   : > { %v455_v54 = vsel %vm3352_vm3, %v450_v44, %v454_v26  ;;  %v542_v55 = vunpack.c.l.b16 %v441_v49  ;;  %v520_v56 = vrot.slane %v519_v45, 4  ;;  %2624 = vmatmul.msk.bf16.vlgmr.msra.gmra.mxu1 %vm300_vm0, %v2610_v51  ;;  %v466_v63 = vshll.u32 %v414_v48, 16  ;;  %v417_v19 = vld [vmem:[%s3337_s10 + $0x20] sm:$0xf]  ;;  %v419_v21 = vld [vmem:[%s3337_s10 + $0x28] sm:$0xf] }
  0x1b   : > { %v543_v60 = vunpack.c.l.b16 %v455_v54  ;;  %v534_v61 = vrot.slane %v533_v50, 4  ;;  %v459_v62 = vrot.slane %v457_v53, 4  ;;  %v462_v2 = vrot.slane %v460_v59, 5  ;;  %v2613_v27 = vld [vmem:[%s3337_s10 + $0x20] sm:$0xf] }
  0x1c   : > { %v525_v0 = vsel %vm3352_vm3, %v520_v56, %v524_v40  ;;  %v471_v3 = vshrl.u32 %v415_v52, 16  ;;  %v474_v4 = vshll.u32 %v415_v52, 16  ;;  %v2586_v8 = vor.u32 %v3144_v58, %v2585_v57  ;;  %v3140_v28 = vld [vmem:[%s3337_s10 + $0x24] sm:$0xf0]  ;;  %v418_v39 = vld [vmem:[%s3337_s10 + $0x24] sm:$0x1] }
  0x1d   : > { %v550_v5 = vpack.c.b16 %v543_v60, %v542_v55  ;;  %v539_v6 = vsel %vm3352_vm3, %v534_v61, %v538_v46  ;;  %v548_v7 = vunpack.c.l.b16 %v525_v0  ;;  %v463_v10 = vor.u32 %v462_v2, %v459_v62  ;;  %v420_v40 = vld [vmem:[%s3337_s10 + $0x2c] sm:$0x1]  ;;  %v2645_v41 = vld [vmem:[%s3337_s10 + $0x90] sm:$0xf]  ;;  %v3149_v43 = vld [vmem:[%s3337_s10 + $0x94] sm:$0xf0] }
  0x1e   : > { %v549_v9 = vunpack.c.l.b16 %v539_v6  ;;  %v473_v11 = vrot.slane %v471_v3, 4  ;;  %v476_v12 = vrot.slane %v474_v4, 5  ;;  %v480_v13 = vshll.u32 %v416_v1, 16  ;;  %v2589_v44 = vld [vmem:[%s3337_s10 + $0x68] sm:$0xf]  ;;  %v3158_v56 = vld [vmem:[%s4181_s1 + $0x20] sm:$0xff] }
  0x1f   : > { %2631 = vmatmul.msk.bf16.vlgmr.msra.gmra.mxu2 %vm300_vm0, %v550_v5  ;;  %v464_v16 = vrot.slane %v463_v10, 4  ;;  %v468_v17 = vrot.slane %v466_v63, 5  ;;  %v485_v23 = vshrl.u32 %v417_v19, 16  ;;  %v488_v24 = vshll.u32 %v417_v19, 16  ;;  %v3145_v45 = vld [vmem:[%s3337_s10 + $0x6c] sm:$0xf0]  ;;  %751 = vmatpush.bf16.msra.mxu0 %v3158_v56 }
  0x20   : > { %v553_v15 = vpack.c.b16 %v549_v9, %v548_v7  ;;  %v477_v18 = vor.u32 %v476_v12, %v473_v11  ;;  %v482_v20 = vrot.slane %v480_v13, 5  ;;  %v499_v29 = vshrl.u32 %v419_v21, 16  ;;  %v2617_v59 = vld [vmem:[%s3337_s10 + $0x30] sm:$0xf]  ;;  %v3141_v60 = vld [vmem:[%s3337_s10 + $0x34] sm:$0xf0] }
  0x21   : > { %v469_v25 = vsel %vm3352_vm3, %v464_v16, %v468_v17  ;;  %v502_v30 = vshll.u32 %v419_v21, 16  ;;  %v2614_v34 = vor.u32 %v3140_v28, %v2613_v27  ;;  %v487_v35 = vrot.slane %v485_v23, 4  ;;  %v2649_v0 = vld [vmem:[%s3337_s10 + $0xa0] sm:$0xf]  ;;  %v3150_v1 = vld [vmem:[%s3337_s10 + $0xa4] sm:$0xf0] }
  0x22   : > { %2634 = vmatmul.msk.bf16.vlgmr.msra.gmra.mxu3 %vm300_vm0, %v553_v15  ;;  %2600 = vmatmul.msk.bf16.gmra.mxu0 %vm300_vm0, %v2586_v8  ;;  %v478_v22 = vrot.slane %v477_v18, 4  ;;  %v544_v31 = vunpack.c.l.b16 %v469_v25  ;;  %v490_v36 = vrot.slane %v488_v24, 5  ;;  %v501_v37 = vrot.slane %v499_v29, 4  ;;  %v2593_v2 = vld [vmem:[%s3337_s10 + $0x78] sm:$0xf]  ;;  %v3164_v19 = vld [vmem:[%s4181_s1 + $0x30] sm:$0xff] }
  0x23   : > { %1120 = vmatpush.bf16.msra.mxu3 %v3169_v14  ;;  %v504_v38 = vrot.slane %v502_v30, 5  ;;  %v494_v47 = vshll.u32 %v418_v39, 16  ;;  %v508_v49 = vshll.u32 %v420_v40, 16  ;;  %v2646_v50 = vor.u32 %v3149_v43, %v2645_v41  ;;  %v3146_v3 = vld [vmem:[%s3337_s10 + $0x7c] sm:$0xf0]  ;;  %v3159_v24 = vld [vmem:[%s4181_s1 + $0x28] sm:$0xff]  ;;  %1034 = vmatpush.bf16.msrb.mxu2 %v3164_v19 }
  0x24   : > { %v483_v26 = vsel %vm3352_vm3, %v478_v22, %v482_v20  ;;  %v491_v46 = vor.u32 %v490_v36, %v487_v35  ;;  %v2590_v51 = vor.u32 %v3145_v45, %v2589_v44  ;;  %v2618_v63 = vor.u32 %v3141_v60, %v2617_v59  ;;  %v2699_v5 = vld [vmem:[%s3337_s10 + $0x90] sm:$0xf]  ;;  %v2701_v6 = vld [vmem:[%s3337_s10 + $0x98] sm:$0xf]  ;;  %v2700_v17 = vld [vmem:[%s3337_s10 + $0x94] sm:$0x1]  ;;  %948 = vmatpush.bf16.msrb.mxu1 %v3159_v24 }
  0x25   : > { %v545_v32 = vunpack.c.l.b16 %v483_v26  ;;  %v505_v48 = vor.u32 %v504_v38, %v501_v37  ;;  %v496_v53 = vrot.slane %v494_v47, 5  ;;  %v510_v55 = vrot.slane %v508_v49, 5  ;;  %v2702_v18 = vld [vmem:[%s3337_s10 + $0x9c] sm:$0x1]  ;;  %v3170_v26 = vld [vmem:[%s4181_s1 + $0x40] sm:$0xff] }
  0x26   : > { %v492_v52 = vrot.slane %v491_v46, 4  ;;  %v798_v7 = vshrl.u32 %v2699_v5, 16  ;;  %v801_v8 = vshll.u32 %v2699_v5, 16  ;;  %v812_v9 = vshrl.u32 %v2701_v6, 16  ;;  %v2733_v35 = vld [vmem:[%s3337_s10 + $0x8] sm:$0xf] }
  0x27   : > { %v551_v42 = vpack.c.b16 %v545_v32, %v544_v31  ;;  %v506_v54 = vrot.slane %v505_v48, 4  ;;  %v815_v10 = vshll.u32 %v2701_v6, 16  ;;  %v2650_v11 = vor.u32 %v3150_v1, %v2649_v0  ;;  %v3160_v36 = vld [vmem:[%s3337_s10 + $0xc] sm:$0xf0]  ;;  %v3151_v39 = vld [vmem:[%s3337_s10 + $0xb4] sm:$0xf0] }
  0x28   : > { %v497_v57 = vsel %vm3352_vm3, %v492_v52, %v496_v53  ;;  %v2594_v12 = vor.u32 %v3146_v3, %v2593_v2  ;;  %v800_v13 = vrot.slane %v798_v7, 4  ;;  %v803_v14 = vrot.slane %v801_v8, 5  ;;  %v2653_v37 = vld [vmem:[%s3337_s10 + $0xb0] sm:$0xf]  ;;  %v2605_v40 = vld [vmem:[%s3337_s10] sm:$0xf] }
  0x29   : > { %v511_v58 = vsel %vm3352_vm3, %v506_v54, %v510_v55  ;;  %v546_v61 = vunpack.c.l.b16 %v497_v57  ;;  %v814_v15 = vrot.slane %v812_v9, 4  ;;  %v817_v16 = vrot.slane %v815_v10, 5  ;;  %v3138_v41 = vld [vmem:[%s3337_s10 + $0x4] sm:$0xf0]  ;;  %v2703_v43 = vld [vmem:[%s3337_s10 + $0xa0] sm:$0xf] }
  0x2a   : > { %2625 = vmatmul.msk.bf16.gmra.mxu1 %vm300_vm0, %v2614_v34  ;;  %v547_v62 = vunpack.c.l.b16 %v511_v58  ;;  %v804_v20 = vor.u32 %v803_v14, %v800_v13  ;;  %v807_v21 = vshll.u32 %v2700_v17, 16  ;;  %v821_v23 = vshll.u32 %v2702_v18, 16  ;;  %v2705_v44 = vld [vmem:[%s3337_s10 + $0xa8] sm:$0xf]  ;;  %v2704_v55 = vld [vmem:[%s3337_s10 + $0xa4] sm:$0x1] }
  0x2b   : > { %v818_v22 = vor.u32 %v817_v16, %v814_v15  ;;  %v826_v45 = vshrl.u32 %v2703_v43, 16  ;;  %v829_v46 = vshll.u32 %v2703_v43, 16  ;;  %v840_v47 = vshrl.u32 %v2705_v44, 16  ;;  %v2706_v56 = vld [vmem:[%s3337_s10 + $0xac] sm:$0x1] }
  0x2c   : > { %v552_v4 = vpack.c.b16 %v547_v62, %v546_v61  ;;  %v805_v25 = vrot.slane %v804_v20, 4  ;;  %v809_v27 = vrot.slane %v807_v21, 5  ;;  %v823_v29 = vrot.slane %v821_v23, 5  ;;  %v2737_v5 = vld [vmem:[%s3337_s10 + $0x18] sm:$0xf] }
  0x2d   : > { %v819_v28 = vrot.slane %v818_v22, 4  ;;  %v843_v48 = vshll.u32 %v2705_v44, 16  ;;  %v2654_v49 = vor.u32 %v3151_v39, %v2653_v37  ;;  %v831_v52 = vrot.slane %v829_v46, 5  ;;  %v3161_v6 = vld [vmem:[%s3337_s10 + $0x1c] sm:$0xf0] }
  0x2e   : > { %v810_v30 = vsel %vm3352_vm3, %v805_v25, %v809_v27  ;;  %v842_v53 = vrot.slane %v840_v47, 4  ;;  %v835_v58 = vshll.u32 %v2704_v55, 16  ;;  %v849_v60 = vshll.u32 %v2706_v56, 16  ;;  %v2657_v7 = vld [vmem:[%s3337_s10 + $0xc0] sm:$0xf] }
  0x2f   : > { %2632 = vmatmul.msk.bf16.gmra.mxu2 %vm300_vm0, %v551_v42  ;;  %v824_v31 = vsel %vm3352_vm3, %v819_v28, %v823_v29  ;;  %v911_v32 = vunpack.c.l.b16 %v810_v30  ;;  %v2734_v42 = vor.u32 %v3160_v36, %v2733_v35  ;;  %v845_v54 = vrot.slane %v843_v48, 5  ;;  %v3152_v9 = vld [vmem:[%s3337_s10 + $0xc4] sm:$0xf0]  ;;  %v2677_v10 = vld [vmem:[%s3337_s10 + $0xd8] sm:$0xf] }
  0x30   : > { %v912_v34 = vunpack.c.l.b16 %v824_v31  ;;  %v837_v62 = vrot.slane %v835_v58, 5  ;;  %v851_v0 = vrot.slane %v849_v60, 5  ;;  %v2707_v13 = vld [vmem:[%s3337_s10 + $0xb0] sm:$0xf]  ;;  %v2709_v14 = vld [vmem:[%s3337_s10 + $0xb8] sm:$0xf]  ;;  %v2658_v19 = vor.u32 %v3152_v9, %v2657_v7 }
  0x31   : > { %v846_v59 = vor.u32 %v845_v54, %v842_v53  ;;  %v854_v15 = vshrl.u32 %v2707_v13, 16  ;;  %v857_v16 = vshll.u32 %v2707_v13, 16  ;;  %v868_v17 = vshrl.u32 %v2709_v14, 16  ;;  %v2708_v25 = vld [vmem:[%s3337_s10 + $0xb4] sm:$0x1] }
  0x32   : > { %2663 = vmatmul.msk.bf16.vlgmr.msrb.gmra.mxu3 %vm300_vm0, %v2646_v50  ;;  %2601 = vmatmul.msk.bf16.gmra.mxu0 %vm300_vm0, %v2590_v51  ;;  %v919_v38 = vpack.c.b16 %v912_v34, %v911_v32  ;;  %v2606_v50 = vor.u32 %v3138_v41, %v2605_v40  ;;  %v828_v51 = vrot.slane %v826_v45, 4  ;;  %v871_v18 = vshll.u32 %v2709_v14, 16  ;;  %v2741_v40 = vld [vmem:[%s3337_s10 + $0x28] sm:$0xf]  ;;  %v3162_v41 = vld [vmem:[%s3337_s10 + $0x2c] sm:$0xf0] }
  0x33   : > { %3250 = vmatpush.bf16.msrb.mxu3 %v3170_v26  ;;  %v856_v21 = vrot.slane %v854_v15, 4  ;;  %v859_v22 = vrot.slane %v857_v16, 5  ;;  %v870_v23 = vrot.slane %v868_v17, 4  ;;  %v863_v28 = vshll.u32 %v2708_v25, 16  ;;  %v3165_v44 = vld [vmem:[%s3337_s10 + $0x54] sm:$0xf0] }
  0x34   : > { %v832_v57 = vor.u32 %v831_v52, %v828_v51  ;;  %v873_v24 = vrot.slane %v871_v18, 5  ;;  %v2681_v45 = vld [vmem:[%s3337_s10 + $0xe8] sm:$0xf]  ;;  %v3155_v46 = vld [vmem:[%s3337_s10 + $0xec] sm:$0xf0]  ;;  %v2742_v47 = vor.u32 %v3162_v41, %v2741_v40 }
  0x35   : > { %v860_v27 = vor.u32 %v859_v22, %v856_v21  ;;  %v865_v32 = vrot.slane %v863_v28, 5  ;;  %v2711_v48 = vld [vmem:[%s3337_s10 + $0xc0] sm:$0xf]  ;;  %v2682_v55 = vor.u32 %v3155_v46, %v2681_v45  ;;  %v2712_v60 = vld [vmem:[%s3337_s10 + $0xc4] sm:$0x1] }
  0x36   : > { %v833_v61 = vrot.slane %v832_v57, 4  ;;  %v874_v29 = vor.u32 %v873_v24, %v870_v23  ;;  %v885_v51 = vshll.u32 %v2711_v48, 16  ;;  %v2769_v13 = vld [vmem:[%s3337_s10 + $0x60] sm:$0xf]  ;;  %v3166_v14 = vld [vmem:[%s3337_s10 + $0x64] sm:$0xf0] }
  0x37   : > { %v861_v31 = vrot.slane %v860_v27, 4  ;;  %v2685_v15 = vld [vmem:[%s3337_s10 + $0xf8] sm:$0xf]  ;;  %v3156_v16 = vld [vmem:[%s3337_s10 + $0xfc] sm:$0xf0]  ;;  %v2770_v18 = vor.u32 %v3166_v14, %v2769_v13 }
  0x38   : > { %v838_v1 = vsel %vm3352_vm3, %v833_v61, %v837_v62  ;;  %v875_v34 = vrot.slane %v874_v29, 4  ;;  %v887_v57 = vrot.slane %v885_v51, 5  ;;  %v2714_v61 = vld [vmem:[%s3337_s10 + $0xcc] sm:$0x1]  ;;  %v2789_v21 = vld [vmem:[%s3337_s10 + $0x10] sm:$0xf] }
  0x39   : > { %v913_v3 = vunpack.c.l.b16 %v838_v1  ;;  %v866_v36 = vsel %vm3352_vm3, %v861_v31, %v865_v32  ;;  %v905_v1 = vshll.u32 %v2714_v61, 16  ;;  %v1181_v24 = vshrl.u32 %v2789_v21, 16  ;;  %v2790_v31 = vld [vmem:[%s3337_s10 + $0x14] sm:$0x1]  ;;  %v2773_v32 = vld [vmem:[%s3337_s10 + $0x70] sm:$0xf] }
  0x3a   : > { %2626 = vmatmul.msk.bf16.gmra.mxu1 %vm300_vm0, %v2618_v63  ;;  %v847_v63 = vrot.slane %v846_v59, 4  ;;  %v1184_v25 = vshll.u32 %v2789_v21, 16  ;;  %v1190_v40 = vshll.u32 %v2790_v31, 16  ;;  %v2793_v51 = vld [vmem:[%s3337_s10 + $0x20] sm:$0xf] }
  0x3b   : > { %v1183_v28 = vrot.slane %v1181_v24, 4  ;;  %v1212_v61 = vshll.u32 %v2793_v51, 16  ;;  %v2792_v14 = vld [vmem:[%s3337_s10 + $0x1c] sm:$0x1] }
  0x3c   : > { %v852_v2 = vsel %vm3352_vm3, %v847_v63, %v851_v0  ;;  %v891_v63 = vshll.u32 %v2712_v60, 16  ;;  %v1186_v29 = vrot.slane %v1184_v25, 5  ;;  %v1209_v60 = vshrl.u32 %v2793_v51, 16 }
  0x3d   : > { %v1214_v13 = vrot.slane %v1212_v61, 5  ;;  %v2800_v61 = vld [vmem:[%s3337_s10 + $0x3c] sm:$0x1] }
  0x3f   : > { %2633 = vmatmul.msk.bf16.gmra.mxu2 %vm300_vm0, %v552_v4  ;;  %v914_v4 = vunpack.c.l.b16 %v852_v2 }
  0x41   : > { %v920_v8 = vpack.c.b16 %v914_v4, %v913_v3  ;;  %v893_v3 = vrot.slane %v891_v63, 5  ;;  %v2777_v63 = vld [vmem:[%s3337_s10 + $0x80] sm:$0xf] }
  0x42   : > { %2664 = vmatmul.msk.bf16.gmra.mxu3 %vm300_vm0, %v2650_v11  ;;  %2602 = vmatmul.msk.bf16.gmra.mxu0 %vm300_vm0, %v2594_v12  ;;  %v3154_v11 = vld [vmem:[%s3337_s10 + $0xdc] sm:$0xf0]  ;;  %v2738_v12 = vor.u32 %v3161_v6, %v2737_v5  ;;  %v907_v5 = vrot.slane %v905_v1, 5 }
  0x43   : > { %v2678_v20 = vor.u32 %v3154_v11, %v2677_v10  ;;  %v2745_v10 = vld [vmem:[%s3337_s10 + $0x38] sm:$0xf]  ;;  %v3163_v11 = vld [vmem:[%s3337_s10 + $0x3c] sm:$0xf0] }
  0x44   : > { %v2746_v17 = vor.u32 %v3163_v11, %v2745_v10 }
  0x4a   : > { %2719 = vmatmul.msk.bf16.vlgmr.msrb.gmra.mxu1 %vm300_vm0, %v919_v38  ;;  %v915_v38 = vunpack.c.l.b16 %v866_v36  ;;  %v3157_v36 = vld [vmem:[%s3337_s10 + $0x10c] sm:$0xf0] }
  0x4f   : > { %2751 = vmatmul.msk.bf16.vlgmr.msrb.gmra.mxu2 %vm300_vm0, %v2734_v42  ;;  %v2765_v42 = vld [vmem:[%s3337_s10 + $0x50] sm:$0xf] }
  0x50   : > { %v2766_v54 = vor.u32 %v3165_v44, %v2765_v42 }
  0x52   : > { %2665 = vmatmul.msk.bf16.gmra.mxu3 %vm300_vm0, %v2654_v49  ;;  %2623 = vmatmul.msk.bf16.vlgmr.msrb.gmra.mxu0 %vm300_vm0, %v2606_v50  ;;  %v2713_v49 = vld [vmem:[%s3337_s10 + $0xc8] sm:$0xf]  ;;  %v882_v50 = vshrl.u32 %v2711_v48, 16 }
  0x53   : > { %1317 = vmatpush.bf16.msrb.mxu0 %v3170_v26  ;;  %v2710_v26 = vld [vmem:[%s3337_s10 + $0xbc] sm:$0x1]  ;;  %v896_v52 = vshrl.u32 %v2713_v49, 16  ;;  %v899_v53 = vshll.u32 %v2713_v49, 16  ;;  %v2795_v48 = vld [vmem:[%s3337_s10 + $0x28] sm:$0xf] }
  0x54   : > { %v877_v30 = vshll.u32 %v2710_v26, 16  ;;  %v884_v56 = vrot.slane %v882_v50, 4  ;;  %v2797_v49 = vld [vmem:[%s3337_s10 + $0x30] sm:$0xf]  ;;  %v2791_v50 = vld [vmem:[%s3337_s10 + $0x18] sm:$0xf] }
  0x55   : > { %v898_v58 = vrot.slane %v896_v52, 4  ;;  %v901_v59 = vrot.slane %v899_v53, 5 }
  0x56   : > { %v879_v35 = vrot.slane %v877_v30, 5  ;;  %v888_v62 = vor.u32 %v887_v57, %v884_v56  ;;  %v2788_v30 = vld [vmem:[%s3337_s10 + $0xc] sm:$0x1]  ;;  %v1237_v56 = vshrl.u32 %v2797_v49, 16  ;;  %v1240_v57 = vshll.u32 %v2797_v49, 16 }
  0x57   : > { %v902_v0 = vor.u32 %v901_v59, %v898_v58  ;;  %v1195_v58 = vshrl.u32 %v2791_v50, 16  ;;  %v1198_v59 = vshll.u32 %v2791_v50, 16 }
  0x58   : > { %v880_v37 = vsel %vm3352_vm3, %v875_v34, %v879_v35  ;;  %v889_v2 = vrot.slane %v888_v62, 4  ;;  %v3167_v34 = vld [vmem:[%s3337_s10 + $0x74] sm:$0xf0]  ;;  %v2689_v35 = vld [vmem:[%s3337_s10 + $0x108] sm:$0xf] }
  0x59   : > { %v916_v39 = vunpack.c.l.b16 %v880_v37  ;;  %v903_v4 = vrot.slane %v902_v0, 4  ;;  %v2774_v41 = vor.u32 %v3167_v34, %v2773_v32  ;;  %v2690_v42 = vor.u32 %v3157_v36, %v2689_v35  ;;  %v3168_v0 = vld [vmem:[%s3337_s10 + $0x84] sm:$0xf0] }
  0x5a   : > { %2720 = vmatmul.msk.bf16.gmra.mxu1 %vm300_vm0, %v920_v8  ;;  %v894_v6 = vsel %vm3352_vm3, %v889_v2, %v893_v3  ;;  %v1197_v10 = vrot.slane %v1195_v58, 4  ;;  %v1200_v11 = vrot.slane %v1198_v59, 5 }
  0x5b   : > { %v921_v43 = vpack.c.b16 %v916_v39, %v915_v38  ;;  %v908_v7 = vsel %vm3352_vm3, %v903_v4, %v907_v5  ;;  %v917_v8 = vunpack.c.l.b16 %v894_v6  ;;  %v1176_v38 = vshll.u32 %v2788_v30, 16  ;;  %v2796_v4 = vld [vmem:[%s3337_s10 + $0x2c] sm:$0x1] }
  0x5c   : > { %v918_v9 = vunpack.c.l.b16 %v908_v7  ;;  %v1187_v39 = vor.u32 %v1186_v29, %v1183_v28  ;;  %v1239_v7 = vrot.slane %v1237_v56, 4 }
  0x5d   : > { %v1178_v45 = vrot.slane %v1176_v38, 5  ;;  %v2799_v38 = vld [vmem:[%s3337_s10 + $0x38] sm:$0xf] }
  0x5e   : > { %v1188_v46 = vrot.slane %v1187_v39, 4  ;;  %v2801_v39 = vld [vmem:[%s3337_s10 + $0x40] sm:$0xf] }
  0x5f   : > { %2752 = vmatmul.msk.bf16.gmra.mxu2 %vm300_vm0, %v2738_v12  ;;  %v922_v12 = vpack.c.b16 %v918_v9, %v917_v8  ;;  %v1242_v8 = vrot.slane %v1240_v57, 5  ;;  %v2798_v9 = vld [vmem:[%s3337_s10 + $0x34] sm:$0x1]  ;;  %v1265_v49 = vshrl.u32 %v2801_v39, 16  ;;  %v1268_v50 = vshll.u32 %v2801_v39, 16 }
  0x60   : > { %v1246_v21 = vshll.u32 %v2798_v9, 16 }
  0x61   : > { %v1267_v59 = vrot.slane %v1265_v49, 4  ;;  %v3177_v49 = vld [vmem:[%s4182_s2 + $0x30] sm:$0xff] }
  0x62   : > { %2666 = vmatmul.msk.bf16.gmra.mxu3 %vm300_vm0, %v2658_v19  ;;  %2695 = vmatmul.msk.bf16.vlgmr.msra.gmra.mxu0 %vm300_vm0, %v2678_v20  ;;  %v2686_v19 = vor.u32 %v3156_v16, %v2685_v15  ;;  %v2787_v20 = vld [vmem:[%s3337_s10 + $0x8] sm:$0xf]  ;;  %v2794_v15 = vld [vmem:[%s3337_s10 + $0x24] sm:$0x1]  ;;  %v2778_v16 = vor.u32 %v3168_v0, %v2777_v63  ;;  %v1248_v32 = vrot.slane %v1246_v21, 5 }
  0x63   : > { %v1167_v22 = vshrl.u32 %v2787_v20, 16  ;;  %v1170_v23 = vshll.u32 %v2787_v20, 16  ;;  %v1243_v20 = vor.u32 %v1242_v8, %v1239_v7  ;;  %v1218_v25 = vshll.u32 %v2794_v15, 16  ;;  %v2802_v63 = vld [vmem:[%s3337_s10 + $0x44] sm:$0x1] }
  0x64   : > { %v1274_v7 = vshll.u32 %v2802_v63, 16  ;;  %v3182_v63 = vld [vmem:[%s4182_s2 + $0x58] sm:$0xff] }
  0x65   : > { %v1169_v26 = vrot.slane %v1167_v22, 4  ;;  %v1172_v27 = vrot.slane %v1170_v23, 5  ;;  %v1201_v22 = vor.u32 %v1200_v11, %v1197_v10  ;;  %v1204_v23 = vshll.u32 %v2792_v14, 16 }
  0x66   : > { %v1244_v31 = vrot.slane %v1243_v20, 4 }
  0x67   : > { %v1173_v37 = vor.u32 %v1172_v27, %v1169_v26  ;;  %v1202_v34 = vrot.slane %v1201_v22, 4  ;;  %v1206_v35 = vrot.slane %v1204_v23, 5 }
  0x69   : > { %v1174_v44 = vrot.slane %v1173_v37, 4  ;;  %v1220_v37 = vrot.slane %v1218_v25, 5 }
  0x6a   : > { %2721 = vmatmul.msk.bf16.gmra.mxu1 %vm300_vm0, %v921_v43 }
  0x6b   : > { %v1179_v52 = vsel %vm3352_vm3, %v1174_v44, %v1178_v45  ;;  %v1207_v44 = vsel %vm3352_vm3, %v1202_v34, %v1206_v35 }
  0x6c   : > { %v1280_v2 = vunpack.c.l.b16 %v1179_v52 }
  0x6f   : > { %2753 = vmatmul.msk.bf16.gmra.mxu2 %vm300_vm0, %v2742_v47  ;;  %v1192_v47 = vrot.slane %v1190_v40, 5 }
  0x71   : > { %v1193_v53 = vsel %vm3352_vm3, %v1188_v46, %v1192_v47  ;;  %v1251_v47 = vshrl.u32 %v2799_v38, 16 }
  0x72   : > { %2783 = vmatmul.msk.bf16.vlgmr.msra.gmra.mxu3 %vm300_vm0, %v2766_v54  ;;  %2696 = vmatmul.msk.bf16.gmra.mxu0 %vm300_vm0, %v2682_v55  ;;  %v1223_v54 = vshrl.u32 %v2795_v48, 16  ;;  %v1226_v55 = vshll.u32 %v2795_v48, 16  ;;  %v1281_v3 = vunpack.c.l.b16 %v1193_v53  ;;  %v1254_v48 = vshll.u32 %v2799_v38, 16 }
  0x73   : > { %v1253_v57 = vrot.slane %v1251_v47, 4 }
  0x74   : > { %v1225_v5 = vrot.slane %v1223_v54, 4  ;;  %v1228_v6 = vrot.slane %v1226_v55, 5  ;;  %v1282_v55 = vunpack.c.l.b16 %v1207_v44  ;;  %v1256_v58 = vrot.slane %v1254_v48, 5  ;;  %v3186_v44 = vld [vmem:[%s4182_s2 + $0x78] sm:$0xff]  ;;  %v3185_v48 = vld [vmem:[%s4182_s2 + $0x70] sm:$0xff] }
  0x75   : > { %2123 = vmatpush.bf16.msra.mxu2 %v3186_v44  ;;  %v3171_v44 = vld [vmem:[%s4182_s2] sm:$0xff] }
  0x79   : > { %2124 = vmatpush.bf16.msra.mxu2 %v3185_v48 }
  0x7a   : > { %2722 = vmatmul.msk.bf16.gmra.mxu1 %vm300_vm0, %v922_v12  ;;  %v1211_v12 = vrot.slane %v1209_v60, 4  ;;  %v1270_v60 = vrot.slane %v1268_v50, 5 }
  0x7c   : > { %v1215_v24 = vor.u32 %v1214_v13, %v1211_v12  ;;  %v1276_v13 = vrot.slane %v1274_v7, 5 }
  0x7e   : > { %v1216_v36 = vrot.slane %v1215_v24, 4 }
  0x7f   : > { %2754 = vmatmul.msk.bf16.gmra.mxu2 %vm300_vm0, %v2746_v17  ;;  %v1288_v17 = vpack.c.b16 %v1281_v3, %v1280_v2 }
  0x80   : > { %v1221_v45 = vsel %vm3352_vm3, %v1216_v36, %v1220_v37 }
  0x81   : > { %v1283_v56 = vunpack.c.l.b16 %v1221_v45  ;;  %v3178_v45 = vld [vmem:[%s4182_s2 + $0x38] sm:$0xff] }
  0x82   : > { %2784 = vmatmul.msk.bf16.gmra.mxu3 %vm300_vm0, %v2770_v18  ;;  %2697 = vmatmul.msk.bf16.gmra.mxu0 %vm300_vm0, %v2686_v19  ;;  %v1229_v18 = vor.u32 %v1228_v6, %v1225_v5  ;;  %v1232_v19 = vshll.u32 %v2796_v4, 16  ;;  %v1257_v4 = vor.u32 %v1256_v58, %v1253_v57  ;;  %v1260_v5 = vshll.u32 %v2800_v61, 16  ;;  %v3183_v57 = vld [vmem:[%s4182_s2 + $0x60] sm:$0xff] }
  0x83   : > { %v1289_v2 = vpack.c.b16 %v1283_v56, %v1282_v55  ;;  %v1271_v6 = vor.u32 %v1270_v60, %v1267_v59  ;;  %2094 = vmatpush.bf16.msra.mxu1 %v3178_v45  ;;  %v3175_v58 = vld [vmem:[%s4182_s2 + $0x20] sm:$0xff] }
  0x84   : > { %v1230_v29 = vrot.slane %v1229_v18, 4  ;;  %v1234_v30 = vrot.slane %v1232_v19, 5  ;;  %v1258_v10 = vrot.slane %v1257_v4, 4  ;;  %v1262_v11 = vrot.slane %v1260_v5, 5  ;;  %v3193_v4 = vld [vmem:[%s4182_s2 + $0xb0] sm:$0xff] }
  0x85   : > { %v1272_v12 = vrot.slane %v1271_v6, 4 }
  0x87   : > { %2095 = vmatpush.bf16.msra.mxu1 %v3177_v49  ;;  %v3187_v49 = vld [vmem:[%s4182_s2 + $0x80] sm:$0xff] }
  0x8f   : > { %v3503_v43 = vpop.f32.mrf.mxu0 }
  0x92   : > { %2785 = vmatmul.msk.bf16.gmra.mxu3 %vm300_vm0, %v2774_v41  ;;  %2698 = vmatmul.msk.bf16.gmra.mxu0 %vm300_vm0, %v2690_v42  ;;  %v1235_v41 = vsel %vm3352_vm3, %v1230_v29, %v1234_v30  ;;  %v1249_v42 = vsel %vm3352_vm3, %v1244_v31, %v1248_v32 }
  0x93   : > { %v1284_v53 = vunpack.c.l.b16 %v1235_v41  ;;  %v1285_v54 = vunpack.c.l.b16 %v1249_v42 }
  0x97   : > { %v3515_v62 = vpop.f32.mrf.mxu0  ;;  %v394_v1 = vpop.f32.mrf.mxu1 }
  0x9f   : > { %v327_v26 = vpop.f32.mrf.mxu0  ;;  %v3525_v28 = vpop.f32.mrf.mxu1 }
  0xa0   : > { %v3523_v27 = vadd.f32 %v394_v1, %v327_v26  ;;  %v1290_v1 = vpack.c.b16 %v1285_v54, %v1284_v53  ;;  %v3184_v53 = vld [vmem:[%s4182_s2 + $0x68] sm:$0xff] }
  0xa1   : > { %v3176_v54 = vld [vmem:[%s4182_s2 + $0x28] sm:$0xff]  ;;  %2125 = vmatpush.bf16.msra.mxu2 %v3184_v53 }
  0xa2   : > { %2786 = vmatmul.msk.bf16.gmra.mxu3 %vm300_vm0, %v2778_v16  ;;  %2807 = vmatmul.msk.bf16.vlgmr.msrb.gmra.mxu0 %vm300_vm0, %v1288_v17  ;;  %v581_v51 = vpop.f32.mrf.mxu2  ;;  %v1263_v16 = vsel %vm3352_vm3, %v1258_v10, %v1262_v11  ;;  %v1277_v17 = vsel %vm3352_vm3, %v1272_v12, %v1276_v13  ;;  %v3181_v10 = vld [vmem:[%s4182_s2 + $0x50] sm:$0xff]  ;;  %v3192_v11 = vld [vmem:[%s4182_s2 + $0xa8] sm:$0xff]  ;;  %v3202_v12 = vld [vmem:[%s4182_s2 + $0xf8] sm:$0xff] }
  0xa3   : > { %v1286_v18 = vunpack.c.l.b16 %v1263_v16  ;;  %v1287_v19 = vunpack.c.l.b16 %v1277_v17  ;;  %2096 = vmatpush.bf16.msra.mxu1 %v3176_v54  ;;  %2181 = vmatpush.bf16.msra.mxu0 %v3202_v12  ;;  %v3191_v17 = vld [vmem:[%s4182_s2 + $0xa0] sm:$0xff] }
  0xa5   : > { %v596_v40 = vpop.f32.mrf.mxu3  ;;  %v1291_v23 = vpack.c.b16 %v1287_v19, %v1286_v18  ;;  %2126 = vmatpush.bf16.msra.mxu2 %v3183_v57  ;;  %v3201_v18 = vld [vmem:[%s4182_s2 + $0xf0] sm:$0xff]  ;;  %v3196_v57 = vld [vmem:[%s4182_s2 + $0xc8] sm:$0xff] }
  0xa7   : > { %v3539_v46 = vpop.f32.mrf.mxu0  ;;  %v399_v52 = vpop.f32.mrf.mxu1  ;;  %2097 = vmatpush.bf16.msra.mxu1 %v3175_v58  ;;  %2182 = vmatpush.bf16.msra.mxu0 %v3201_v18 }
  0xa9   : > { %2127 = vmatpush.bf16.msra.mxu2 %v3182_v63 }
  0xaa   : > { %v3545_v8 = vpop.f32.mrf.mxu2 }
  0xad   : > { %v3543_v0 = vpop.f32.mrf.mxu3  ;;  %2128 = vmatpush.bf16.msra.mxu2 %v3181_v10 }
  0xaf   : > { %v332_v3 = vpop.f32.mrf.mxu0  ;;  %v3549_v9 = vpop.f32.mrf.mxu1 }
  0xb0   : > { %v400_v38 = vadd.f32 %v399_v52, %v332_v3 }
  0xb2   : > { %2809 = vmatmul.msk.bf16.vlgmr.msrb.gmra.mxu3 %vm300_vm0, %v1290_v1  ;;  %2808 = vmatmul.msk.bf16.gmra.mxu0 %vm300_vm0, %v1289_v2  ;;  %v586_v20 = vpop.f32.mrf.mxu2  ;;  %v3194_v1 = vld [vmem:[%s4182_s2 + $0xb8] sm:$0xff] }
  0xb3   : > { %v603_v29 = vadd.f32 %v586_v20, %v3523_v27  ;;  %v3174_v2 = vld [vmem:[%s4182_s2 + $0x18] sm:$0xff]  ;;  %2152 = vmatpush.bf16.msra.mxu3 %v3194_v1  ;;  %v3275_v20 = vmov 0.0  }
  0xb4   : > { %2098 = vmatpush.bf16.msra.mxu1 %v3174_v2  ;;  %1379 = vst [vmem:[#allocation2] sm:$0xff] %v3275_v20 }
  0xb5   : > { %v667_v14 = vpop.f32.mrf.mxu3  ;;  %1385 = vst [vmem:[#allocation2 + $0x10] sm:$0x1] %v3275_v20 }
  0xb6   : > { %1380 = vst [vmem:[#allocation2 + $0x8] sm:$0x3] %v3275_v20 }
  0xb7   : > { %v3551_v15 = vpop.f32.mrf.mxu0  ;;  %v404_v22 = vpop.f32.mrf.mxu1  ;;  %2153 = vmatpush.bf16.msra.mxu3 %v3193_v4  ;;  %1382 = vst [vmem:[#allocation2 + $0x90] sm:$0xff] %v3275_v20 }
  0xb8   : > { %1383 = vst [vmem:[#allocation2 + $0x98] sm:$0x3] %v3275_v20 }
  0xb9   : > { %1386 = vst [vmem:[#allocation2 + $0x20] sm:$0x1] %v3275_v20 }
  0xba   : > { %v3563_v32 = vpop.f32.mrf.mxu2  ;;  %1387 = vst [vmem:[#allocation2 + $0x30] sm:$0x1] %v3275_v20 }
  0xbb   : > { %2154 = vmatpush.bf16.msra.mxu3 %v3192_v11  ;;  %1388 = vst [vmem:[#allocation2 + $0x40] sm:$0x1] %v3275_v20  ;;  %v3210_v11 = vld [vmem:[%s4182_s2 + $0x138] sm:$0xff] }
  0xbc   : > { %1389 = vst [vmem:[#allocation2 + $0x50] sm:$0x1] %v3275_v20 }
  0xbd   : > { %v3557_v21 = vpop.f32.mrf.mxu3  ;;  %1390 = vst [vmem:[#allocation2 + $0x60] sm:$0x1] %v3275_v20 }
  0xbe   : > { %1391 = vst [vmem:[#allocation2 + $0x70] sm:$0x1] %v3275_v20 }
  0xbf   : > { %v337_v24 = vpop.f32.mrf.mxu0  ;;  %v3612_v60 = vpop.f32.mrf.mxu1  ;;  %2155 = vmatpush.bf16.msra.mxu3 %v3191_v17  ;;  %1392 = vst [vmem:[#allocation2 + $0x80] sm:$0x1] %v3275_v20 }
  0xc0   : > { %v405_v25 = vadd.f32 %v404_v22, %v337_v24  ;;  %v3180_v22 = vld [vmem:[%s4182_s2 + $0x48] sm:$0xff]  ;;  %1393 = vst [vmem:[#allocation2 + $0x19] sm:$0x1] %v3275_v20 }
  0xc1   : > { %v3200_v24 = vld [vmem:[%s4182_s2 + $0xe8] sm:$0xff]  ;;  %2129 = vmatpush.bf16.msra.mxu2 %v3180_v22  ;;  %1394 = vst [vmem:[#allocation2 + $0x29] sm:$0x1] %v3275_v20 }
  0xc2   : > { %2810 = vmatmul.msk.bf16.gmra.mxu3 %vm300_vm0, %v1291_v23  ;;  %v607_v26 = vadd.f32 %v596_v40, %v405_v25  ;;  %v591_v37 = vpop.f32.mrf.mxu2  ;;  %v3190_v23 = vld [vmem:[%s4182_s2 + $0x98] sm:$0xff]  ;;  %2183 = vmatpush.bf16.msra.mxu0 %v3200_v24  ;;  %1395 = vst [vmem:[#allocation2 + $0x39] sm:$0x1] %v3275_v20  ;;  %v397_v24 = vadd.f32 %v3525_v28, %v3539_v46 }
  0xc3   : > { %v605_v41 = vadd.f32 %v591_v37, %v400_v38  ;;  %2156 = vmatpush.bf16.msra.mxu3 %v3190_v23  ;;  %1396 = vst [vmem:[#allocation2 + $0x49] sm:$0x1] %v3275_v20 }
  0xc4   : > { %1397 = vst [vmem:[#allocation2 + $0x59] sm:$0x1] %v3275_v20 }
  0xc5   : > { %v672_v30 = vpop.f32.mrf.mxu3  ;;  %1398 = vst [vmem:[#allocation2 + $0x69] sm:$0x1] %v3275_v20 }
  0xc6   : > { %v3561_v31 = vadd.f32 %v672_v30, %v603_v29  ;;  %v3172_v29 = vld [vmem:[%s4182_s2 + $0x8] sm:$0xff]  ;;  %v3189_v30 = vld [vmem:[%s4182_s2 + $0x90] sm:$0xff]  ;;  %1399 = vst [vmem:[#allocation2 + $0x79] sm:$0x1] %v3275_v20 }
  0xc7   : > { %v3565_v33 = vpop.f32.mrf.mxu0  ;;  %v3632_v6 = vpop.f32.mrf.mxu1  ;;  %2157 = vmatpush.bf16.msra.mxu3 %v3189_v30  ;;  %1400 = vst [vmem:[#allocation2 + $0x89] sm:$0x1] %v3275_v20  ;;  %v1417_v30 = vld [vmem:[#allocation2 + $0x1] sm:$0xff] }
  0xca   : > { %v3630_v5 = vpop.f32.mrf.mxu2 }
  0xcd   : > { %v3567_v34 = vpop.f32.mrf.mxu3 }
  0xcf   : > { %v389_v35 = vpop.f32.mrf.mxu0  ;;  %v3671_v25 = vpop.f32.mrf.mxu1 }
  0xd0   : > { %v390_v36 = vadd.f32 %v389_v35, %v3503_v43  ;;  %v3199_v35 = vld [vmem:[%s4182_s2 + $0xe0] sm:$0xff] }
  0xd1   : > { %2184 = vmatpush.bf16.msra.mxu0 %v3199_v35 }
  0xd2   : > { %v601_v39 = vadd.f32 %v581_v51, %v390_v36  ;;  %v3650_v16 = vpop.f32.mrf.mxu2  ;;  %v3179_v36 = vld [vmem:[%s4182_s2 + $0x40] sm:$0xff] }
  0xd3   : > { %2130 = vmatpush.bf16.msra.mxu2 %v3179_v36 }
  0xd4   : > { %v3570_v42 = vadd.f32 %v667_v14, %v601_v39  ;;  %v3173_v14 = vld [vmem:[%s4182_s2 + $0x10] sm:$0xff]  ;;  %v3188_v39 = vld [vmem:[%s4182_s2 + $0x88] sm:$0xff] }
  0xd5   : > { %v677_v40 = vpop.f32.mrf.mxu3  ;;  %2099 = vmatpush.bf16.msra.mxu1 %v3173_v14  ;;  %2158 = vmatpush.bf16.msra.mxu3 %v3188_v39 }
  0xd6   : > { %v3572_v27 = vadd.f32 %v677_v40, %v605_v41  ;;  %v3198_v41 = vld [vmem:[%s4182_s2 + $0xd8] sm:$0xff] }
  0xd7   : > { %v3580_v47 = vpop.f32.mrf.mxu0  ;;  %v955_v45 = vpop.f32.mrf.mxu1  ;;  %2185 = vmatpush.bf16.msra.mxu0 %v3198_v41 }
  0xd8   : > { %v392_v48 = vadd.f32 %v3580_v47, %v3515_v62 }
  0xd9   : > { %2100 = vmatpush.bf16.msra.mxu1 %v3172_v29  ;;  %2159 = vmatpush.bf16.msra.mxu3 %v3187_v49 }
  0xda   : > { %v1038_v37 = vpop.f32.mrf.mxu2  ;;  %v602_v54 = vadd.f32 %v3545_v8, %v392_v48  ;;  %v3195_v8 = vld [vmem:[%s4182_s2 + $0xc0] sm:$0xff] }
  0xdd   : > { %v3582_v43 = vpop.f32.mrf.mxu3  ;;  %2101 = vmatpush.bf16.msra.mxu1 %v3171_v44 }
  0xdf   : > { %v3590_v50 = vpop.f32.mrf.mxu0  ;;  %v957_v63 = vpop.f32.mrf.mxu1 }
  0xe0   : > { %v773_v53 = vadd.f32 %v3590_v50, %v3570_v42  ;;  %v688_v50 = vadd.f32 %v3557_v21, %v602_v54  ;;  %v3218_v21 = vld [vmem:[%s4182_s2 + $0x178] sm:$0xff] }
  0xe1   : > { %2239 = vmatpush.bf16.msrb.mxu2 %v3218_v21  ;;  %2210 = vmatpush.bf16.msrb.mxu1 %v3210_v11 }
  0xe2   : > { %v1041_v62 = vpop.f32.mrf.mxu2  ;;  %v970_v42 = vadd.f32 %v3632_v6, %v773_v53  ;;  %v3749_v6 = vld [vmem:[%s4184_s4] ss:$0 sm:$0xff] }
  0xe4   : > { %v1056_v1 = vadd.f32 %v3650_v16, %v970_v42 }
  0xe5   : > { %v682_v51 = vpop.f32.mrf.mxu3 }
  0xe6   : > { %v3592_v52 = vadd.f32 %v682_v51, %v607_v26  ;;  %v3197_v51 = vld [vmem:[%s4182_s2 + $0xd0] sm:$0xff] }
  0xe7   : > { %v3600_v55 = vpop.f32.mrf.mxu0  ;;  %2186 = vmatpush.bf16.msra.mxu0 %v3197_v51 }
  0xe8   : > { %v774_v2 = vadd.f32 %v3600_v55, %v688_v50 }
  0xea   : > { %v3757_v12 = vpop.f32.mrf.mxu2  ;;  %v971_v14 = vadd.f32 %v3671_v25, %v774_v2  ;;  %v960_v25 = vpop.f32.mrf.mxu1 }
  0xeb   : > { %2187 = vmatpush.bf16.msra.mxu0 %v3196_v57 }
  0xec   : > { %v1057_v18 = vadd.f32 %v1038_v37, %v971_v14  ;;  %v3217_v37 = vld [vmem:[%s4182_s2 + $0x170] sm:$0xff] }
  0xed   : > { %v3602_v56 = vpop.f32.mrf.mxu3  ;;  %2240 = vmatpush.bf16.msrb.mxu2 %v3217_v37 }
  0xef   : > { %v3610_v59 = vpop.f32.mrf.mxu0  ;;  %2188 = vmatpush.bf16.msra.mxu0 %v3195_v8 }
  0xf0   : > { %v775_v22 = vadd.f32 %v3610_v59, %v3561_v31  ;;  %v3209_v31 = vld [vmem:[%s4182_s2 + $0x130] sm:$0xff]  ;;  %v604_v59 = vadd.f32 %v3563_v32, %v397_v24  ;;  %v402_v32 = vadd.f32 %v3549_v9, %v3551_v15  ;;  %v3208_v9 = vld [vmem:[%s4182_s2 + $0x128] sm:$0xff]  ;;  %v3215_v24 = vld [vmem:[%s4182_s2 + $0x160] sm:$0xff] }
  0xf1   : > { %2211 = vmatpush.bf16.msrb.mxu1 %v3209_v31 }
  0xf2   : > { %v972_v28 = vadd.f32 %v955_v45, %v775_v22  ;;  %v1046_v44 = vpop.f32.mrf.mxu2  ;;  %v606_v54 = vadd.f32 %v3630_v5, %v402_v32  ;;  %v962_v5 = vpop.f32.mrf.mxu1 }
  0xf4   : > { %v1058_v51 = vadd.f32 %v1041_v62, %v972_v28  ;;  %v692_v15 = vadd.f32 %v3582_v43, %v606_v54 }
  0xf5   : > { %v3614_v61 = vpop.f32.mrf.mxu3  ;;  %2212 = vmatpush.bf16.msrb.mxu1 %v3208_v9 }
  0xf6   : > { %v1142_v10 = vadd.f32 %v3614_v61, %v1056_v1  ;;  %v3763_v61 = vld [vmem:[%s4185_s5] ss:$0 sm:$0xff] }
  0xf7   : > { %v3625_v3 = vpop.f32.mrf.mxu0 }
  0xfa   : > { %v965_v28 = vpop.f32.mrf.mxu1 }
  0xfd   : > { %v3634_v7 = vpop.f32.mrf.mxu3 }
  0xfe   : > { %v1143_v35 = vadd.f32 %v3634_v7, %v1057_v18  ;;  %v690_v7 = vadd.f32 %v3567_v34, %v604_v59  ;;  %v1425_v34 = vld [vmem:[#allocation2 + $0x2] sm:$0xff]  ;;  %v407_v59 = vadd.f32 %v3612_v60, %v3565_v33  ;;  %v3234_v33 = vld [vmem:[%s4182_s2 + $0x1f8] sm:$0xff]  ;;  %v3225_v60 = vld [vmem:[%s4182_s2 + $0x1b0] sm:$0xff] }
  0xff   : > { %v3645_v13 = vpop.f32.mrf.mxu0  ;;  %2297 = vmatpush.bf16.msrb.mxu0 %v3234_v33 }
 0x100   : > { %v777_v48 = vadd.f32 %v3645_v13, %v3572_v27  ;;  %v776_v45 = vadd.f32 %v3625_v3, %v690_v7  ;;  %v3216_v13 = vld [vmem:[%s4182_s2 + $0x168] sm:$0xff]  ;;  %v608_v54 = vadd.f32 %v3543_v0, %v407_v59  ;;  %v3233_v0 = vld [vmem:[%s4182_s2 + $0x1f0] sm:$0xff] }
 0x101   : > { %2241 = vmatpush.bf16.msrb.mxu2 %v3216_v13  ;;  %v3224_v13 = vld [vmem:[%s4182_s2 + $0x1a8] sm:$0xff]  ;;  %v3221_v59 = vld [vmem:[%s4182_s2 + $0x190] sm:$0xff] }
 0x102   : > { %v974_v50 = vadd.f32 %v960_v25, %v777_v48  ;;  %v973_v3 = vadd.f32 %v957_v63, %v776_v45  ;;  %v3207_v25 = vld [vmem:[%s4182_s2 + $0x120] sm:$0xff] }
 0x103   : > { %2213 = vmatpush.bf16.msrb.mxu1 %v3207_v25  ;;  %2298 = vmatpush.bf16.msrb.mxu0 %v3233_v0  ;;  %v3222_v25 = vld [vmem:[%s4182_s2 + $0x198] sm:$0xff] }
 0x104   : > { %v1060_v63 = vadd.f32 %v1046_v44, %v974_v50  ;;  %v1059_v14 = vadd.f32 %v3757_v12, %v973_v3  ;;  %v694_v3 = vadd.f32 %v3602_v56, %v608_v54  ;;  %v3242_v54 = vld [vmem:[%s4182_s2 + $0x238] sm:$0xff] }
 0x105   : > { %v3658_v19 = vpop.f32.mrf.mxu3  ;;  %2242 = vmatpush.bf16.msrb.mxu2 %v3215_v24 }
 0x106   : > { %v1144_v42 = vadd.f32 %v3658_v19, %v1058_v51  ;;  %v3213_v51 = vld [vmem:[%s4182_s2 + $0x150] sm:$0xff] }
 0x107   : > { %v3673_v26 = vpop.f32.mrf.mxu0 }
 0x108   : > { %v778_v21 = vadd.f32 %v3673_v26, %v692_v15 }
 0x10d   : > { %v3693_v38 = vpop.f32.mrf.mxu3 }
 0x10e   : > { %v1145_v22 = vadd.f32 %v3693_v38, %v1059_v14 }
 0x10f   : > { %v3703_v40 = vpop.f32.mrf.mxu0 }
 0x110   : > { %v779_v7 = vadd.f32 %v3703_v40, %v3592_v52 }
 0x115   : > { %v3724_v47 = vpop.f32.mrf.mxu3 }
 0x117   : > { %v3732_v58 = vpop.f32.mrf.mxu0 }
 0x11d   : > { %v3743_v4 = vpop.f32.mrf.mxu3 }
 0x11f   : > { %v1319_v55 = vpop.f32.mrf.mxu0 }
 0x120   : > { %v1339_v16 = vadd.f32 %v1319_v55, %v1142_v10  ;;  %v1048_v55 = vpop.f32.mrf.mxu2 }
 0x122   : > { %v1351_v17 = vmul.f32 %v3749_v6, %v1339_v16  ;;  %v1146_v16 = vadd.f32 %v3724_v47, %v1060_v63  ;;  %v3226_v47 = vld [vmem:[%s4182_s2 + $0x1b8] sm:$0xff]  ;;  %v967_v63 = vpop.f32.mrf.mxu1 }
 0x123   : > { %2268 = vmatpush.bf16.msrb.mxu3 %v3226_v47 }
 0x124   : > { %v1363_v23 = vadd.f32 %v3763_v61, %v1351_v17  ;;  %v975_v17 = vadd.f32 %v962_v5, %v778_v21  ;;  %v3212_v21 = vld [vmem:[%s4182_s2 + $0x148] sm:$0xff] }
 0x125   : > { %v3771_v29 = vpop.f32.mrf.mxu3 }
 0x126   : > { %v3774_v36 = vmax.f32 %v1363_v23, 0.0 }
 0x127   : > { %v1321_v39 = vpop.f32.mrf.mxu0  ;;  %2269 = vmatpush.bf16.msrb.mxu3 %v3225_v60 }
 0x128   : > { %1401 = vst [vmem:[#allocation2 + $0x11] sm:$0xff] %v3774_v36  ;;  %v1340_v46 = vadd.f32 %v1321_v39, %v1143_v35  ;;  %v1483_v41 = vpack.c.bf16 %v3774_v36, %v1417_v30  ;;  %v1061_v39 = vadd.f32 %v1048_v55, %v975_v17  ;;  %v1051_v40 = vpop.f32.mrf.mxu2  ;;  %v3204_v55 = vld [vmem:[%s4182_s2 + $0x108] sm:$0xff] }
 0x12a   : > { %v1352_v49 = vmul.f32 %v3749_v6, %v1340_v46  ;;  %2131 = vmatmul.bf16.vlgmr.msra.gmra.mxu2 %v1483_v41  ;;  %v3214_v46 = vld [vmem:[%s4182_s2 + $0x158] sm:$0xff] }
 0x12b   : > { %v3206_v41 = vld [vmem:[%s4182_s2 + $0x118] sm:$0xff]  ;;  %2243 = vmatpush.bf16.msrb.mxu2 %v3214_v46  ;;  %2270 = vmatpush.bf16.msrb.mxu3 %v3224_v13 }
 0x12c   : > { %v1364_v53 = vadd.f32 %v3763_v61, %v1352_v49  ;;  %v1147_v49 = vadd.f32 %v3743_v4, %v1061_v39  ;;  %2214 = vmatpush.bf16.msrb.mxu1 %v3206_v41  ;;  %v976_v4 = vadd.f32 %v965_v28, %v779_v7  ;;  %v3230_v39 = vld [vmem:[%s4182_s2 + $0x1d8] sm:$0xff]  ;;  %v3203_v28 = vld [vmem:[%s4182_s2 + $0x100] sm:$0xff] }
 0x12d   : > { %v3794_v57 = vpop.f32.mrf.mxu3 }
 0x12e   : > { %v3797_v27 = vmax.f32 %v1364_v53, 0.0  ;;  %v3205_v53 = vld [vmem:[%s4182_s2 + $0x110] sm:$0xff] }
 0x12f   : > { %v1324_v62 = vpop.f32.mrf.mxu0  ;;  %v1410_v8 = vld [vmem:[#allocation2 + $0x10] sm:$0xff]  ;;  %2244 = vmatpush.bf16.msrb.mxu2 %v3213_v51 }
 0x130   : > { %v3806_v1 = vld [vmem:[#allocation2 + $0x12] sm:$0xff]  ;;  %1402 = vst [vmem:[#allocation2 + $0x21] sm:$0xff] %v3797_v27  ;;  %v1341_v19 = vadd.f32 %v1324_v62, %v1144_v42  ;;  %v1482_v2 = vpack.c.bf16 %v1410_v8, %v3275_v20  ;;  %v1486_v43 = vpack.c.bf16 %v3797_v27, %v3774_v36  ;;  %2215 = vmatpush.bf16.msrb.mxu1 %v3205_v53  ;;  %v3247_v53 = vld [vmem:[%s4183_s3] sm:$0xff]  ;;  %v3236_v36 = vld [vmem:[%s4182_s2 + $0x208] sm:$0xff] }
 0x131   : > { %v1484_v10 = vpack.c.bf16 %v3806_v1, %v1425_v34 }
 0x132   : > { %v1353_v11 = vmul.f32 %v3749_v6, %v1341_v19  ;;  %2102 = vmatmul.bf16.vlgmr.msra.gmra.mxu1 %v1482_v2  ;;  %v1062_v2 = vadd.f32 %v1051_v40, %v976_v4 }
 0x133   : > { %2160 = vmatmul.bf16.vlgmr.msra.gmra.mxu3 %v1484_v10  ;;  %v780_v10 = vadd.f32 %v3732_v58, %v694_v3  ;;  %v3232_v58 = vld [vmem:[%s4182_s2 + $0x1e8] sm:$0xff]  ;;  %2245 = vmatpush.bf16.msrb.mxu2 %v3212_v21 }
 0x134   : > { %v1365_v20 = vadd.f32 %v3763_v61, %v1353_v11  ;;  %v3223_v11 = vld [vmem:[%s4182_s2 + $0x1a0] sm:$0xff]  ;;  %v1148_v14 = vadd.f32 %v3771_v29, %v1062_v2  ;;  %2216 = vmatpush.bf16.msrb.mxu1 %v3204_v55  ;;  %2299 = vmatpush.bf16.msrb.mxu0 %v3232_v58 }
 0x135   : > { %v1329_v18 = vpop.f32.mrf.mxu3  ;;  %v977_v17 = vadd.f32 %v967_v63, %v780_v10  ;;  %2271 = vmatpush.bf16.msrb.mxu3 %v3223_v11  ;;  %v3231_v29 = vld [vmem:[%s4182_s2 + $0x1e0] sm:$0xff]  ;;  %v3240_v11 = vld [vmem:[%s4182_s2 + $0x228] sm:$0xff] }
 0x136   : > { %v3819_v26 = vmax.f32 %v1365_v20, 0.0  ;;  %v1343_v23 = vadd.f32 %v1329_v18, %v1146_v16 }
 0x137   : > { %v1326_v12 = vpop.f32.mrf.mxu0  ;;  %v1434_v30 = vld [vmem:[#allocation2 + $0x20] sm:$0xff] }
 0x138   : > { %1403 = vst [vmem:[#allocation2 + $0x31] sm:$0xff] %v3819_v26  ;;  %v1355_v38 = vmul.f32 %v3749_v6, %v1343_v23  ;;  %v1342_v35 = vadd.f32 %v1326_v12, %v1145_v22  ;;  %v1485_v37 = vpack.c.bf16 %v1434_v30, %v1410_v8  ;;  %v3834_v31 = vpack.c.bf16 %v3819_v26, %v3797_v27  ;;  %v3869_v50 = vld [vmem:[#allocation2 + $0x22] sm:$0xff]  ;;  %v1053_v23 = vpop.f32.mrf.mxu2 }
 0x139   : > { %2272 = vmatpush.bf16.msrb.mxu3 %v3222_v25  ;;  %2300 = vmatpush.bf16.msrb.mxu0 %v3231_v29  ;;  %v3244_v25 = vld [vmem:[%s3337_s10 + $0xec] sm:$0xf0] }
 0x13a   : > { %v1367_v44 = vadd.f32 %v3763_v61, %v1355_v38  ;;  %v1354_v48 = vmul.f32 %v3749_v6, %v1342_v35  ;;  %2189 = vmatmul.bf16.vlgmr.msra.gmra.mxu0 %v1485_v37  ;;  %2136 = vmatmul.bf16.gmra.mxu2 %v3834_v31  ;;  %v1063_v38 = vadd.f32 %v1053_v23, %v977_v17  ;;  %v3211_v37 = vld [vmem:[%s4182_s2 + $0x140] sm:$0xff]  ;;  %v3238_v17 = vld [vmem:[%s4182_s2 + $0x218] sm:$0xff] }
 0x13b   : > { %2246 = vmatpush.bf16.msrb.mxu2 %v3211_v37  ;;  %2217 = vmatpush.bf16.msrb.mxu1 %v3203_v28 }
 0x13c   : > { %v3856_v32 = vmax.f32 %v1367_v44, 0.0  ;;  %v1366_v52 = vadd.f32 %v3763_v61, %v1354_v48  ;;  %v1149_v46 = vadd.f32 %v3794_v57, %v1063_v38  ;;  %v3229_v57 = vld [vmem:[%s4182_s2 + $0x1d0] sm:$0xff] }
 0x13d   : > { %v1331_v45 = vpop.f32.mrf.mxu3  ;;  %2273 = vmatpush.bf16.msrb.mxu3 %v3221_v59  ;;  %2301 = vmatpush.bf16.msrb.mxu0 %v3230_v39  ;;  %v3119_v59 = vld [vmem:[%s3337_s10 + $0xf8] sm:$0xf]  ;;  %v3245_v39 = vld [vmem:[%s3337_s10 + $0xfc] sm:$0xf0] }
 0x13e   : > { %1405 = vst [vmem:[#allocation2 + $0x51] sm:$0xff] %v3856_v32  ;;  %v3867_v34 = vmax.f32 %v1366_v52, 0.0  ;;  %v1344_v42 = vadd.f32 %v1331_v45, %v1147_v49  ;;  %v3220_v49 = vld [vmem:[%s4182_s2 + $0x188] sm:$0xff]  ;;  %v3120_v28 = vor.u32 %v3245_v39, %v3119_v59 }
 0x13f   : > { %v1412_v9 = vld [vmem:[#allocation2 + $0x30] sm:$0xff]  ;;  %2436 = vmatpush.bf16.msra.mxu2 %v3247_v53  ;;  %2326 = vmatpush.bf16.msra.mxu1 %v3242_v54 }
 0x140   : > { %v3874_v15 = vld [vmem:[#allocation2 + $0x32] sm:$0xff]  ;;  %1404 = vst [vmem:[#allocation2 + $0x41] sm:$0xff] %v3867_v34  ;;  %v1356_v5 = vmul.f32 %v3749_v6, %v1344_v42  ;;  %v3882_v62 = vpack.c.bf16 %v1412_v9, %v1434_v30  ;;  %v1495_v19 = vpack.c.bf16 %v3867_v34, %v3819_v26  ;;  %v3921_v47 = vpack.c.bf16 %v3856_v32, %v3867_v34 }
 0x141   : > { %v3886_v8 = vpack.c.bf16 %v3874_v15, %v3869_v50  ;;  %2274 = vmatpush.bf16.msrb.mxu3 %v3220_v49  ;;  %2302 = vmatpush.bf16.msrb.mxu0 %v3229_v57  ;;  %v3123_v57 = vld [vmem:[%s3337_s10 + $0x108] sm:$0xf] }
 0x142   : > { %v1368_v56 = vadd.f32 %v3763_v61, %v1356_v5  ;;  %2107 = vmatmul.bf16.gmra.mxu1 %v3882_v62  ;;  %v3241_v5 = vld [vmem:[%s4182_s2 + $0x230] sm:$0xff] }
 0x143   : > { %2165 = vmatmul.bf16.gmra.mxu3 %v3886_v8  ;;  %2327 = vmatpush.bf16.msra.mxu1 %v3241_v5 }
 0x144   : > { %v3907_v16 = vmax.f32 %v1368_v56, 0.0 }
 0x145   : > { %v1334_v20 = vpop.f32.mrf.mxu3  ;;  %v1414_v33 = vld [vmem:[#allocation2 + $0x50] sm:$0xff] }
 0x146   : > { %1406 = vst [vmem:[#allocation2 + $0x61] sm:$0xff] %v3907_v16  ;;  %v1345_v18 = vadd.f32 %v1334_v20, %v1148_v14  ;;  %v1504_v22 = vpack.c.bf16 %v3907_v16, %v3856_v32  ;;  %v3941_v60 = vld [vmem:[#allocation2 + $0x52] sm:$0xff]  ;;  %v1487_v14 = vpack.c.bf16 %v3869_v50, %v3806_v1  ;;  %v3239_v20 = vld [vmem:[%s4182_s2 + $0x220] sm:$0xff] }
 0x147   : > { %v1436_v24 = vld [vmem:[#allocation2 + $0x40] sm:$0xff]  ;;  %2328 = vmatpush.bf16.msra.mxu1 %v3240_v11  ;;  %v3237_v50 = vld [vmem:[%s4182_s2 + $0x210] sm:$0xff] }
 0x148   : > { %v1357_v12 = vmul.f32 %v3749_v6, %v1345_v18  ;;  %v1494_v30 = vpack.c.bf16 %v1436_v24, %v1412_v9  ;;  %v1429_v44 = vld [vmem:[#allocation2 + $0x42] sm:$0xff]  ;;  %v1500_v40 = vpack.c.bf16 %v1414_v33, %v1436_v24 }
 0x149   : > { %v3951_v45 = vpack.c.bf16 %v3941_v60, %v1429_v44  ;;  %v3227_v9 = vld [vmem:[%s4182_s2 + $0x1c0] sm:$0xff]  ;;  %v1496_v1 = vpack.c.bf16 %v1429_v44, %v3874_v15  ;;  %v3111_v15 = vld [vmem:[%s3337_s10 + $0xd8] sm:$0xf]  ;;  %v3115_v24 = vld [vmem:[%s3337_s10 + $0xe8] sm:$0xf] }
 0x14a   : > { %v1369_v35 = vadd.f32 %v3763_v61, %v1357_v12  ;;  %2194 = vmatmul.bf16.gmra.mxu0 %v1494_v30  ;;  %2141 = vmatmul.bf16.gmra.mxu2 %v3921_v47  ;;  %v3116_v12 = vor.u32 %v3244_v25, %v3115_v24 }
 0x14b   : > { %2329 = vmatpush.bf16.msra.mxu1 %v3239_v20 }
 0x14c   : > { %v3938_v41 = vmax.f32 %v1369_v35, 0.0 }
 0x14d   : > { %v1336_v7 = vpop.f32.mrf.mxu3  ;;  %v1438_v42 = vld [vmem:[#allocation2 + $0x60] sm:$0xff] }
 0x14e   : > { %1407 = vst [vmem:[#allocation2 + $0x71] sm:$0xff] %v3938_v41  ;;  %v1346_v48 = vadd.f32 %v1336_v7, %v1149_v46  ;;  %v1503_v0 = vpack.c.bf16 %v1438_v42, %v1414_v33  ;;  %v1510_v3 = vpack.c.bf16 %v3938_v41, %v3907_v16  ;;  %v1431_v56 = vld [vmem:[#allocation2 + $0x62] sm:$0xff] }
 0x14f   : > { %2330 = vmatpush.bf16.msra.mxu1 %v3238_v17  ;;  %v1505_v27 = vpack.c.bf16 %v1431_v56, %v3941_v60 }
 0x150   : > { %v1358_v52 = vmul.f32 %v3749_v6, %v1346_v48  ;;  %v3219_v6 = vld [vmem:[%s4182_s2 + $0x180] sm:$0xff] }
 0x151   : > { %2275 = vmatpush.bf16.msrb.mxu3 %v3219_v6 }
 0x152   : > { %v1370_v51 = vadd.f32 %v3763_v61, %v1358_v52  ;;  %2112 = vmatmul.bf16.gmra.mxu1 %v1500_v40  ;;  %v3228_v61 = vld [vmem:[%s4182_s2 + $0x1c8] sm:$0xff]  ;;  %v3246_v52 = vld [vmem:[%s3337_s10 + $0x10c] sm:$0xf0] }
 0x153   : > { %2170 = vmatmul.bf16.gmra.mxu3 %v3951_v45  ;;  %2303 = vmatpush.bf16.msrb.mxu0 %v3228_v61  ;;  %v1481_v61 = vld [vmem:[#allocation2 + $0x92] sm:$0xff] }
 0x154   : > { %v3967_v4 = vmax.f32 %v1370_v51, 0.0  ;;  %2331 = vmatpush.bf16.msra.mxu1 %v3237_v50 }
 0x155   : > { %v1416_v2 = vld [vmem:[#allocation2 + $0x70] sm:$0xff] }
 0x156   : > { %1408 = vst [vmem:[#allocation2 + $0x81] sm:$0xff] %v3967_v4  ;;  %v1513_v13 = vpack.c.bf16 %v3967_v4, %v3938_v41  ;;  %v1432_v10 = vld [vmem:[#allocation2 + $0x72] sm:$0xff]  ;;  %v1509_v21 = vpack.c.bf16 %v1416_v2, %v1438_v42 }
 0x157   : > { %2304 = vmatpush.bf16.msrb.mxu0 %v3227_v9  ;;  %v3980_v63 = vpack.c.bf16 %v1432_v10, %v1431_v56 }
 0x158   : > { %2332 = vmatpush.bf16.msra.mxu1 %v3236_v36 }
 0x15a   : > { %2199 = vmatmul.bf16.gmra.mxu0 %v1503_v0  ;;  %2146 = vmatmul.bf16.gmra.mxu2 %v1510_v3 }
 0x15d   : > { %v1440_v58 = vld [vmem:[#allocation2 + $0x80] sm:$0xff] }
 0x15e   : > { %v1512_v55 = vpack.c.bf16 %v1440_v58, %v1416_v2  ;;  %v1456_v26 = vld [vmem:[#allocation2 + $0x82] sm:$0xff]  ;;  %v1515_v34 = vpack.c.bf16 0.0, %v1440_v58 }
 0x162   : > { %2117 = vmatmul.bf16.gmra.mxu1 %v1509_v21 }
 0x163   : > { %2175 = vmatmul.bf16.gmra.mxu3 %v3980_v63 }
 0x16a   : > { %2204 = vmatmul.bf16.gmra.mxu0 %v1512_v55  ;;  %2247 = vmatmul.bf16.vlgmr.msrb.gmra.mxu2 %v1487_v14 }
 0x172   : > { %2218 = vmatmul.bf16.vlgmr.msrb.gmra.mxu1 %v1486_v43  ;;  %v3235_v43 = vld [vmem:[%s4182_s2 + $0x200] sm:$0xff] }
 0x173   : > { %2276 = vmatmul.bf16.vlgmr.msrb.gmra.mxu3 %v3882_v62  ;;  %2333 = vmatpush.bf16.msra.mxu1 %v3235_v43  ;;  %v3243_v62 = vld [vmem:[%s3337_s10 + $0xdc] sm:$0xf0] }
 0x174   : > { %v3112_v18 = vor.u32 %v3243_v62, %v3111_v15 }
 0x17a   : > { %2305 = vmatmul.bf16.vlgmr.msrb.gmra.mxu0 %v3834_v31  ;;  %2252 = vmatmul.bf16.gmra.mxu2 %v1496_v1  ;;  %v1514_v31 = vpack.c.bf16 %v1456_v26, %v1432_v10 }
 0x182   : > { %2223 = vmatmul.bf16.gmra.mxu1 %v1495_v19  ;;  %v1473_v19 = vld [vmem:[#allocation2 + $0x91] sm:$0xff] }
 0x183   : > { %2281 = vmatmul.bf16.gmra.mxu3 %v1500_v40  ;;  %v1516_v23 = vpack.c.bf16 %v1473_v19, %v3967_v4 }
 0x18a   : > { %2310 = vmatmul.bf16.gmra.mxu0 %v3921_v47  ;;  %2257 = vmatmul.bf16.gmra.mxu2 %v1505_v27 }
 0x192   : > { %2228 = vmatmul.bf16.gmra.mxu1 %v1504_v22 }
 0x193   : > { %2286 = vmatmul.bf16.gmra.mxu3 %v1509_v21 }
 0x19a   : > { %2315 = vmatmul.bf16.gmra.mxu0 %v1510_v3  ;;  %2262 = vmatmul.bf16.gmra.mxu2 %v1514_v31 }
 0x1a2   : > { %2233 = vmatmul.bf16.gmra.mxu1 %v1513_v13  ;;  %v1517_v13 = vpack.c.bf16 %v1481_v61, %v1456_v26 }
 0x1a3   : > { %2291 = vmatmul.bf16.gmra.mxu3 %v1515_v34 }
 0x1aa   : > { %2320 = vmatmul.bf16.gmra.mxu0 %v1516_v23  ;;  %3129 = vmatmul.msk.bf16.vlgmr.msra.gmra.mxu2 %vm300_vm0, %v3112_v18 }
 0x1ad   : > { %v2132_v32 = vpop.f32.mrf.mxu2 }
 0x1af   : > { %v2103_v16 = vpop.f32.mrf.mxu1 }
 0x1b0   : > { %v4021_v22 = vadd.f32 %v2132_v32, %v2103_v16 }
 0x1b2   : > { %2334 = vmatmul.bf16.vlgmr.msra.gmra.mxu1 %v3886_v8 }
 0x1b5   : > { %v2134_v29 = vpop.f32.mrf.mxu2 }
 0x1b6   : > { %v2161_v7 = vpop.f32.mrf.mxu3 }
 0x1b7   : > { %v2105_v30 = vpop.f32.mrf.mxu1  ;;  %v2190_v44 = vpop.f32.mrf.mxu0  ;;  %v2162_v24 = vadd.f32 %v2161_v7, %v4021_v22 }
 0x1b8   : > { %v4026_v47 = vadd.f32 %v2134_v29, %v2105_v30 }
 0x1b9   : > { %v2191_v29 = vadd.f32 %v2190_v44, %v2162_v24 }
 0x1ba   : > { %3130 = vmatmul.msk.bf16.gmra.mxu2 %vm300_vm0, %v3116_v12 }
 0x1bd   : > { %v2137_v38 = vpop.f32.mrf.mxu2 }
 0x1be   : > { %v2163_v49 = vpop.f32.mrf.mxu3 }
 0x1bf   : > { %v2108_v35 = vpop.f32.mrf.mxu1  ;;  %v2192_v51 = vpop.f32.mrf.mxu0 }
 0x1c0   : > { %v4029_v37 = vadd.f32 %v2137_v38, %v2108_v35  ;;  %v2164_v35 = vadd.f32 %v2163_v49, %v4026_v47  ;;  %v4096_v47 = vld [vmem:[%s4184_s4 + $0x1] ss:$0 sm:$0xff] }
 0x1c2   : > { %2339 = vmatmul.bf16.gmra.mxu1 %v3951_v45  ;;  %v3124_v45 = vor.u32 %v3246_v52, %v3123_v57  ;;  %v4102_v52 = vld [vmem:[%s4185_s5 + $0x2] ss:$0 sm:$0xff] }
 0x1c5   : > { %v2139_v8 = vpop.f32.mrf.mxu2 }
 0x1c6   : > { %v2166_v6 = vpop.f32.mrf.mxu3 }
 0x1c7   : > { %v2110_v46 = vpop.f32.mrf.mxu1  ;;  %v2195_v0 = vpop.f32.mrf.mxu0 }
 0x1c8   : > { %v4034_v41 = vadd.f32 %v2139_v8, %v2110_v46 }
 0x1ca   : > { %3131 = vmatmul.msk.bf16.gmra.mxu2 %vm300_vm0, %v3120_v28  ;;  %v2193_v28 = vadd.f32 %v2192_v51, %v2164_v35 }
 0x1cd   : > { %v2142_v48 = vpop.f32.mrf.mxu2 }
 0x1ce   : > { %v2168_v5 = vpop.f32.mrf.mxu3 }
 0x1cf   : > { %v2113_v33 = vpop.f32.mrf.mxu1  ;;  %v4049_v56 = vpop.f32.mrf.mxu0 }
 0x1d0   : > { %v4037_v60 = vadd.f32 %v2142_v48, %v2113_v33  ;;  %v4090_v48 = vld [vmem:[%s4184_s4 + $0x2] ss:$0 sm:$0xff]  ;;  %v2167_v33 = vadd.f32 %v2166_v6, %v4029_v37  ;;  %v4107_v37 = vld [vmem:[%s4185_s5 + $0x1] ss:$0 sm:$0xff] }
 0x1d2   : > { %2344 = vmatmul.bf16.gmra.mxu1 %v3980_v63  ;;  %v2196_v6 = vadd.f32 %v2195_v0, %v2167_v33 }
 0x1d5   : > { %v2144_v40 = vpop.f32.mrf.mxu2 }
 0x1d6   : > { %v4051_v11 = vpop.f32.mrf.mxu3 }
 0x1d7   : > { %v2115_v53 = vpop.f32.mrf.mxu1  ;;  %v4053_v58 = vpop.f32.mrf.mxu0 }
 0x1d8   : > { %v4042_v54 = vadd.f32 %v2144_v40, %v2115_v53 }
 0x1da   : > { %3132 = vmatmul.msk.bf16.gmra.mxu2 %vm300_vm0, %v3124_v45 }
 0x1dd   : > { %v2147_v4 = vpop.f32.mrf.mxu2 }
 0x1de   : > { %v4055_v20 = vpop.f32.mrf.mxu3 }
 0x1df   : > { %v2118_v42 = vpop.f32.mrf.mxu1  ;;  %v4057_v1 = vpop.f32.mrf.mxu0 }
 0x1e0   : > { %v4045_v9 = vadd.f32 %v2147_v4, %v2118_v42 }
 0x1e2   : > { %2349 = vmatmul.bf16.gmra.mxu1 %v1517_v13 }
 0x1e5   : > { %v2149_v3 = vpop.f32.mrf.mxu2 }
 0x1e6   : > { %v4059_v36 = vpop.f32.mrf.mxu3 }
 0x1e7   : > { %v2120_v2 = vpop.f32.mrf.mxu1  ;;  %v4063_v26 = vpop.f32.mrf.mxu0 }
 0x1e8   : > { %v4047_v10 = vadd.f32 %v2149_v3, %v2120_v2 }
 0x1ed   : > { %v2248_v21 = vpop.f32.mrf.mxu2 }
 0x1ee   : > { %v4067_v34 = vpop.f32.mrf.mxu3 }
 0x1ef   : > { %v2219_v63 = vpop.f32.mrf.mxu1  ;;  %v4071_v62 = vpop.f32.mrf.mxu0 }
 0x1f0   : > { %v2220_v30 = vadd.f32 %v2219_v63, %v2191_v29 }
 0x1f2   : > { %v2249_v8 = vadd.f32 %v2248_v21, %v2220_v30  ;;  %v2169_v21 = vadd.f32 %v2168_v5, %v4034_v41 }
 0x1f4   : > { %v2198_v29 = vadd.f32 %v4049_v56, %v2169_v21 }
 0x1f5   : > { %v2250_v55 = vpop.f32.mrf.mxu2 }
 0x1f6   : > { %v2277_v23 = vpop.f32.mrf.mxu3 }
 0x1f7   : > { %v2221_v14 = vpop.f32.mrf.mxu1  ;;  %v2306_v32 = vpop.f32.mrf.mxu0  ;;  %v2278_v46 = vadd.f32 %v2277_v23, %v2249_v8 }
 0x1f8   : > { %v2222_v22 = vadd.f32 %v2221_v14, %v2193_v28 }
 0x1f9   : > { %v2307_v57 = vadd.f32 %v2306_v32, %v2278_v46 }
 0x1fa   : > { %v2251_v45 = vadd.f32 %v2250_v55, %v2222_v22 }
 0x1fd   : > { %v2253_v17 = vpop.f32.mrf.mxu2 }
 0x1fe   : > { %v2279_v12 = vpop.f32.mrf.mxu3 }
 0x1ff   : > { %v2224_v50 = vpop.f32.mrf.mxu1  ;;  %v2308_v59 = vpop.f32.mrf.mxu0  ;;  %v2280_v61 = vadd.f32 %v2279_v12, %v2251_v45 }
 0x200   : > { %v2225_v13 = vadd.f32 %v2224_v50, %v2196_v6 }
 0x201   : > { %v2309_v63 = vadd.f32 %v2308_v59, %v2280_v61 }
 0x202   : > { %v2254_v23 = vadd.f32 %v2253_v17, %v2225_v13  ;;  %v2172_v17 = vadd.f32 %v4051_v11, %v4037_v60 }
 0x205   : > { %v4061_v27 = vpop.f32.mrf.mxu2 }
 0x206   : > { %v2282_v7 = vpop.f32.mrf.mxu3 }
 0x207   : > { %v2226_v43 = vpop.f32.mrf.mxu1  ;;  %v2311_v53 = vpop.f32.mrf.mxu0  ;;  %v2283_v12 = vadd.f32 %v2282_v7, %v2254_v23 }
 0x208   : > { %v2227_v30 = vadd.f32 %v2226_v43, %v2198_v29  ;;  %v2201_v43 = vadd.f32 %v4053_v58, %v2172_v17 }
 0x209   : > { %v2312_v28 = vadd.f32 %v2311_v53, %v2283_v12 }
 0x20a   : > { %v2256_v7 = vadd.f32 %v4061_v27, %v2227_v30  ;;  %v2174_v27 = vadd.f32 %v4055_v20, %v4042_v54 }
 0x20d   : > { %v4065_v31 = vpop.f32.mrf.mxu2 }
 0x20e   : > { %v2284_v14 = vpop.f32.mrf.mxu3 }
 0x20f   : > { %v4069_v15 = vpop.f32.mrf.mxu1  ;;  %v2313_v5 = vpop.f32.mrf.mxu0 }
 0x210   : > { %v2230_v60 = vadd.f32 %v4069_v15, %v2201_v43 }
 0x212   : > { %v2259_v58 = vadd.f32 %v4065_v31, %v2230_v60  ;;  %v2177_v31 = vadd.f32 %v4059_v36, %v4045_v9 }
 0x215   : > { %v4073_v19 = vpop.f32.mrf.mxu2 }
 0x217   : > { %v4075_v18 = vpop.f32.mrf.mxu1 }
 0x21d   : > { %v4077_v16 = vpop.f32.mrf.mxu2 }
 0x21f   : > { %v4080_v25 = vpop.f32.mrf.mxu1 }
 0x225   : > { %v4082_v38 = vpop.f32.mrf.mxu2 }
 0x227   : > { %v4085_v39 = vpop.f32.mrf.mxu1 }
 0x22d   : > { %v2438_v44 = vpop.f32.mrf.mxu2 }
 0x22e   : > { %v2463_v49 = vmul.f32 %v4090_v48, %v2438_v44 }
 0x22f   : > { %v2335_v40 = vpop.f32.mrf.mxu1 }
 0x230   : > { %v2336_v51 = vadd.f32 %v2335_v40, %v2307_v57  ;;  %v2476_v42 = vadd.f32 %v4102_v52, %v2463_v49  ;;  %v2287_v57 = vpop.f32.mrf.mxu3  ;;  %v2285_v49 = vadd.f32 %v2284_v14, %v2256_v7 }
 0x231   : > { %v2288_v21 = vadd.f32 %v2287_v57, %v2259_v58 }
 0x232   : > { %v2360_v4 = vmul.f32 %v4096_v47, %v2336_v51  ;;  %v2316_v51 = vpop.f32.mrf.mxu0  ;;  %v2314_v6 = vadd.f32 %v2313_v5, %v2285_v49 }
 0x234   : > { %v2373_v3 = vadd.f32 %v4107_v37, %v2360_v4 }
 0x235   : > { %v2440_v2 = vpop.f32.mrf.mxu2 }
 0x236   : > { %v2484_v55 = vadd.f32 %v2476_v42, %v2373_v3  ;;  %v2464_v50 = vmul.f32 %v4090_v48, %v2440_v2  ;;  %v2203_v2 = vadd.f32 %v4057_v1, %v2174_v27 }
 0x237   : > { %v2337_v0 = vpop.f32.mrf.mxu1 }
 0x238   : > { %v2492_v32 = vmax.f32 %v2484_v55, 0.0  ;;  %v2338_v24 = vadd.f32 %v2337_v0, %v2309_v63  ;;  %v2477_v59 = vadd.f32 %v4102_v52, %v2464_v50  ;;  %v2289_v63 = vpop.f32.mrf.mxu3  ;;  %v2232_v55 = vadd.f32 %v4075_v18, %v2203_v2 }
 0x239   : > { %v2317_v0 = vadd.f32 %v2316_v51, %v2288_v21  ;;  %v2206_v18 = vadd.f32 %v4063_v26, %v2177_v31 }
 0x23a   : > { %2500 = vst [vmem:[%s4117_s13] sm:$0xff] %v2492_v32  ;;  %v2361_v41 = vmul.f32 %v4096_v47, %v2338_v24  ;;  %v2318_v32 = vpop.f32.mrf.mxu0  ;;  %v2261_v50 = vadd.f32 %v4073_v19, %v2232_v55  ;;  %v2179_v19 = vadd.f32 %v4067_v34, %v4047_v10 }
 0x23b   : > { %v2235_v9 = vadd.f32 %v4080_v25, %v2206_v18 }
 0x23c   : > { %v2374_v35 = vadd.f32 %v4107_v37, %v2361_v41  ;;  %v2290_v41 = vadd.f32 %v2289_v63, %v2261_v50 }
 0x23d   : > { %v2443_v8 = vpop.f32.mrf.mxu2  ;;  %v2264_v26 = vadd.f32 %v4077_v16, %v2235_v9 }
 0x23e   : > { %v2485_v46 = vadd.f32 %v2477_v59, %v2374_v35  ;;  %v2465_v22 = vmul.f32 %v4090_v48, %v2443_v8  ;;  %v2319_v8 = vadd.f32 %v2318_v32, %v2290_v41 }
 0x23f   : > { %v2340_v56 = vpop.f32.mrf.mxu1 }
 0x240   : > { %v2493_v44 = vmax.f32 %v2485_v46, 0.0  ;;  %v2341_v33 = vadd.f32 %v2340_v56, %v2312_v28  ;;  %v2478_v45 = vadd.f32 %v4102_v52, %v2465_v22  ;;  %v2292_v35 = vpop.f32.mrf.mxu3 }
 0x241   : > { %v2293_v25 = vadd.f32 %v2292_v35, %v2264_v26 }
 0x242   : > { %2501 = vst [vmem:[%s4117_s13 + $0x8] sm:$0xff] %v2493_v44  ;;  %v2362_v40 = vmul.f32 %v4096_v47, %v2341_v33  ;;  %v2321_v7 = vpop.f32.mrf.mxu0  ;;  %v2208_v44 = vadd.f32 %v4071_v62, %v2179_v19 }
 0x243   : > { %v2322_v16 = vadd.f32 %v2321_v7, %v2293_v25 }
 0x244   : > { %v2375_v11 = vadd.f32 %v4107_v37, %v2362_v40  ;;  %v2237_v57 = vadd.f32 %v4085_v39, %v2208_v44 }
 0x245   : > { %v2445_v53 = vpop.f32.mrf.mxu2 }
 0x246   : > { %v2486_v61 = vadd.f32 %v2478_v45, %v2375_v11  ;;  %v2466_v3 = vmul.f32 %v4090_v48, %v2445_v53  ;;  %v2266_v62 = vadd.f32 %v4082_v38, %v2237_v57 }
 0x247   : > { %v2342_v4 = vpop.f32.mrf.mxu1 }
 0x248   : > { %v2494_v42 = vmax.f32 %v2486_v61, 0.0  ;;  %v2343_v13 = vadd.f32 %v2342_v4, %v2314_v6  ;;  %v2479_v20 = vadd.f32 %v4102_v52, %v2466_v3  ;;  %v2294_v45 = vpop.f32.mrf.mxu3 }
 0x249   : > { %v2295_v53 = vadd.f32 %v2294_v45, %v2266_v62 }
 0x24a   : > { %2502 = vst [vmem:[%s4117_s13 + $0x10] sm:$0xff] %v2494_v42  ;;  %v2363_v15 = vmul.f32 %v4096_v47, %v2343_v13  ;;  %v2323_v6 = vpop.f32.mrf.mxu0 }
 0x24b   : > { %v2324_v58 = vadd.f32 %v2323_v6, %v2295_v53 }
 0x24c   : > { %v2376_v54 = vadd.f32 %v4107_v37, %v2363_v15 }
 0x24d   : > { %v2448_v14 = vpop.f32.mrf.mxu2 }
 0x24e   : > { %v2487_v23 = vadd.f32 %v2479_v20, %v2376_v54  ;;  %v2467_v1 = vmul.f32 %v4090_v48, %v2448_v14 }
 0x24f   : > { %v2345_v24 = vpop.f32.mrf.mxu1 }
 0x250   : > { %v2495_v29 = vmax.f32 %v2487_v23, 0.0  ;;  %v2346_v12 = vadd.f32 %v2345_v24, %v2317_v0  ;;  %v2480_v30 = vadd.f32 %v4102_v52, %v2467_v1 }
 0x252   : > { %2503 = vst [vmem:[%s4117_s13 + $0x18] sm:$0xff] %v2495_v29  ;;  %v2364_v5 = vmul.f32 %v4096_v47, %v2346_v12 }
 0x254   : > { %v2377_v36 = vadd.f32 %v4107_v37, %v2364_v5 }
 0x255   : > { %v2450_v59 = vpop.f32.mrf.mxu2 }
 0x256   : > { %v2488_v17 = vadd.f32 %v2480_v30, %v2377_v36  ;;  %v2468_v56 = vmul.f32 %v4090_v48, %v2450_v59 }
 0x257   : > { %v2347_v28 = vpop.f32.mrf.mxu1 }
 0x258   : > { %v2496_v46 = vmax.f32 %v2488_v17, 0.0  ;;  %v2348_v22 = vadd.f32 %v2347_v28, %v2319_v8  ;;  %v2481_v34 = vadd.f32 %v4102_v52, %v2468_v56 }
 0x25a   : > { %2504 = vst [vmem:[%s4117_s13 + $0x20] sm:$0xff] %v2496_v46  ;;  %v2365_v33 = vmul.f32 %v4096_v47, %v2348_v22 }
 0x25c   : > { %v2378_v10 = vadd.f32 %v4107_v37, %v2365_v33 }
 0x25d   : > { %v2453_v43 = vpop.f32.mrf.mxu2 }
 0x25e   : > { %v2489_v49 = vadd.f32 %v2481_v34, %v2378_v10  ;;  %v2469_v40 = vmul.f32 %v4090_v48, %v2453_v43 }
 0x25f   : > { %v2350_v60 = vpop.f32.mrf.mxu1 }
 0x260   : > { %v2497_v11 = vmax.f32 %v2489_v49, 0.0  ;;  %v2351_v51 = vadd.f32 %v2350_v60, %v2322_v16  ;;  %v2482_v27 = vadd.f32 %v4102_v52, %v2469_v40 }
 0x262   : > { %2505 = vst [vmem:[%s4117_s13 + $0x28] sm:$0xff] %v2497_v11  ;;  %v2366_v39 = vmul.f32 %v4096_v47, %v2351_v51 }
 0x264   : > { %v2379_v61 = vadd.f32 %v4107_v37, %v2366_v39 }
 0x265   : > { %v2455_v4 = vpop.f32.mrf.mxu2 }
 0x266   : > { %v2490_v42 = vadd.f32 %v2482_v27, %v2379_v61  ;;  %v2470_v38 = vmul.f32 %v4090_v48, %v2455_v4 }
 0x267   : > { %v2352_v13 = vpop.f32.mrf.mxu1 }
 0x268   : > { %v2498_v3 = vmax.f32 %v2490_v42, 0.0  ;;  %v2353_v2 = vadd.f32 %v2352_v13, %v2324_v58  ;;  %v2483_v63 = vadd.f32 %v4102_v52, %v2470_v38 }
 0x26a   : > { %2506 = vst [vmem:[%s4117_s13 + $0x30] sm:$0xff] %v2498_v3  ;;  %v2367_v21 = vmul.f32 %v4096_v47, %v2353_v2 }
 0x26c   : > { %v2380_v15 = vadd.f32 %v4107_v37, %v2367_v21 }
 0x26e   : > { %v2491_v55 = vadd.f32 %v2483_v63, %v2380_v15 }
 0x270   : > { %v2499_v54 = vmax.f32 %v2491_v55, 0.0 }
 0x272   : > { %2507 = vst [vmem:[%s4117_s13 + $0x38] sm:$0xff] %v2499_v54 }
 0x273 PF: > { %s16_s21 = sadd.s32 1, %s3273_s21  }
 0x274   : > { %p13_p4 = scmp.ge.s32.totalorder %s16_s21, 4  }
 0x276   :  { %15 = sbr.rel (!%p13_p4) target bundleno = 1 (0x1), region = 86 }

</bundles_post_ra>
